<compile_context>
chip_gen: v7x
topology: tpu7x:2x2x1
jax: 0.10.0
libtpu: 0.0.40
codegen_flags: <defaults>
</compile_context>

<pallas_src>
import functools

import jax
import jax.numpy as jnp
from jax.experimental import pallas as pl
from jax.experimental.pallas import tpu as pltpu


# ----------------------------------------------------------------------------
# Fused kernel: one grid step == B_tile images of the batch.
# ----------------------------------------------------------------------------
def _bottleneck_kernel(x_ref, w1s_ref, b1s_ref, w2_ref, b2_ref, w3_ref, b3_ref,
                       o_ref, *, B, Ho, Wo, Cin, Cmid, Cout, has_shortcut):
    f32, bf16 = jnp.float32, jnp.bfloat16
    M = B * Ho * Wo

    # ---- input tile (already stride-subsampled by the wrapper) --------------
    xs = x_ref[...].reshape(M, Cin)                 # bf16 if projection shortcut
    xs_mm = xs if xs.dtype == bf16 else xs.astype(bf16)

    # ---- conv1 (1x1) fused with the projection shortcut: one MXU pass -------
    # w1s = [w1*s1 | ws*ss]  (Cin, Cmid [+ Cout]), b1s = [b1 | bs].
    t = jnp.dot(xs_mm, w1s_ref[...], preferred_element_type=f32) + b1s_ref[...]
    if has_shortcut:
        h1 = jnp.maximum(t[:, :Cmid], 0.0)          # (M, Cmid)
        sc = t[:, Cmid:]                            # (M, Cout)
    else:
        h1 = jnp.maximum(t, 0.0)
        sc = xs                                     # identity (f32, Cin == Cout)

    # ---- conv2: grouped 3x3 'SAME' as ONE im2col matmul (K = 9*Cmid) --------
    # Shifted patches are built in-register with small zero strips; no halo
    # scratch buffer and no full-buffer zero fill.
    h1b = h1.reshape(B, Ho, Wo, Cmid)
    zrow = jnp.zeros((B, 1, Wo, Cmid), f32)
    zcol = jnp.zeros((B, Ho, 1, Cmid), f32)

    def shift(a, dy, dx):
        # patch_{dy,dx}[y, x] = h1[y + dy - 1, x + dx - 1]  (zero outside).
        if dy == 0:
            a = jnp.concatenate([zrow, a[:, :Ho - 1]], axis=1)
        elif dy == 2:
            a = jnp.concatenate([a[:, 1:], zrow], axis=1)
        if dx == 0:
            a = jnp.concatenate([zcol, a[:, :, :Wo - 1]], axis=2)
        elif dx == 2:
            a = jnp.concatenate([a[:, :, 1:], zcol], axis=2)
        return a

    patches = jnp.concatenate(
        [shift(h1b, dy, dx) for dy in range(3) for dx in range(3)], axis=-1)
    pm = patches.reshape(M, 9 * Cmid).astype(bf16)
    h2 = jnp.maximum(
        jnp.dot(pm, w2_ref[...], preferred_element_type=f32) + b2_ref[...], 0.0)

    # ---- conv3 (1x1) + BN3 + residual add + ReLU -----------------------------
    y = jnp.dot(h2.astype(bf16), w3_ref[...], preferred_element_type=f32)
    y = y + b3_ref[...]
    out = jnp.maximum(y + sc, 0.0)                  # (M, Cout)

    o_ref[...] = out.reshape(B, Ho, Wo, Cout).astype(o_ref.dtype)


# ----------------------------------------------------------------------------
# VMEM budget helper (accounts for (sublane, lane) tile padding).
# ----------------------------------------------------------------------------
def _padded_vmem_bytes(shape, itemsize):
    shape = tuple(int(d) for d in shape)
    if len(shape) < 2:
        shape = (1,) * (2 - len(shape)) + shape
    sublane = max(1, 32 // itemsize)
    lead = 1
    for d in shape[:-2]:
        lead *= d
    rows = -(-shape[-2] // sublane) * sublane
    cols = -(-shape[-1] // 128) * 128
    return lead * rows * cols * itemsize


def _pick_batch_tile(N, Ho, Wo, target_rows=512):
    bt = max(1, min(N, target_rows // max(1, Ho * Wo)))
    while N % bt:
        bt -= 1
    return bt


# ----------------------------------------------------------------------------
# Public wrapper: NCHW in / NCHW out.
# ----------------------------------------------------------------------------
def bottleneck_forward(x_nchw, p, *, reduce):
    N, Cin, H, W = x_nchw.shape
    stride = 2 if reduce else 1
    assert H % stride == 0 and W % stride == 0, "even spatial dims expected"
    Ho, Wo = H // stride, W // stride
    Cmid = p['w1'].shape[1]
    Cout = p['w3'].shape[1]
    has_shortcut = p['ws'] is not None
    # Identity shortcut is only valid when shapes match and there is no stride.
    assert has_shortcut or (stride == 1 and Cin == Cout), \
        "identity shortcut requires stride==1 and Cin==Cout"

    f32, bf16 = jnp.float32, jnp.bfloat16

    # NCHW -> NHWC; apply the 1x1-conv stride as a subsample once, in XLA,
    # so the kernel only DMAs Ho*Wo rows (and no strided ref reads are needed).
    x = jnp.transpose(x_nchw, (0, 2, 3, 1))
    if stride > 1:
        x = x[:, ::stride, ::stride, :]
    # x is only an MXU operand when a projection shortcut exists -> ship bf16.
    x = x.astype(bf16 if has_shortcut else f32)

    # ---- fold BN scales into weight columns; fuse conv1 with the shortcut ----
    w1e = (p['w1'] * p['s1'][None, :]).astype(f32)
    if has_shortcut:
        wse = (p['ws'] * p['ss'][None, :]).astype(f32)
        w1s = jnp.concatenate([w1e, wse], axis=1).astype(bf16)     # (Cin, Cmid+Cout)
        b1s = jnp.concatenate([p['b1'], p['bs']]).reshape(1, Cmid + Cout)
    else:
        w1s = w1e.astype(bf16)                                     # (Cin, Cmid)
        b1s = p['b1'].reshape(1, Cmid)
    w2c = (p['w2'] * p['s2'][None, None, None, :]).reshape(9 * Cmid, Cmid)
    w2c = w2c.astype(bf16)                                         # im2col weight
    b2 = p['b2'].reshape(1, Cmid)
    w3e = (p['w3'] * p['s3'][None, :]).astype(bf16)                # (Cmid, Cout)
    b3 = p['b3'].reshape(1, Cout)

    # ---- batch blocking -------------------------------------------------------
    B_tile = _pick_batch_tile(N, Ho, Wo)
    num_blocks = N // B_tile
    M_tile = B_tile * Ho * Wo

    args = [x, w1s, b1s, w2c, b2, w3e, b3]
    in_specs = [
        pl.BlockSpec((B_tile, Ho, Wo, Cin), lambda n: (n, 0, 0, 0)),
        pl.BlockSpec(w1s.shape, lambda n: (0, 0)),
        pl.BlockSpec(b1s.shape, lambda n: (0, 0)),
        pl.BlockSpec(w2c.shape, lambda n: (0, 0)),
        pl.BlockSpec(b2.shape, lambda n: (0, 0)),
        pl.BlockSpec(w3e.shape, lambda n: (0, 0)),
        pl.BlockSpec(b3.shape, lambda n: (0, 0)),
    ]

    kernel = functools.partial(
        _bottleneck_kernel, B=B_tile, Ho=Ho, Wo=Wo, Cin=Cin, Cmid=Cmid,
        Cout=Cout, has_shortcut=has_shortcut)

    # ---- cost estimate + explicit VMEM budget --------------------------------
    flops = 2 * N * Ho * Wo * (Cin * (Cmid + (Cout if has_shortcut else 0))
                               + 9 * Cmid * Cmid + Cmid * Cout)
    bytes_accessed = int(sum(int(a.size) * a.dtype.itemsize for a in args)
                         + N * Ho * Wo * Cout * 4)
    x_bytes = _padded_vmem_bytes((B_tile, Ho, Wo, Cin), x.dtype.itemsize)
    out_bytes = _padded_vmem_bytes((B_tile, Ho, Wo, Cout), 4)
    w_bytes = sum(_padded_vmem_bytes(a.shape, a.dtype.itemsize) for a in args[1:])
    interm_bytes = 8 * M_tile * 128 * 4          # a handful of (M, <=128) f32 temps
    needed = 2 * x_bytes + 2 * out_bytes + 2 * w_bytes + interm_bytes
    try:
        hw_vmem = int(pltpu.get_tpu_info().vmem_capacity_bytes)
    except Exception:
        hw_vmem = 64 * 1024 * 1024               # safe for v5e/v6e/v7x
    vmem_limit = int(min(hw_vmem, max(16 * 1024 * 1024, 2 * needed)))

    out = pl.pallas_call(
        kernel,
        grid=(num_blocks,),
        in_specs=in_specs,
        out_specs=pl.BlockSpec((B_tile, Ho, Wo, Cout), lambda n: (n, 0, 0, 0)),
        out_shape=jax.ShapeDtypeStruct((N, Ho, Wo, Cout), jnp.float32),
        compiler_params=pltpu.CompilerParams(
            dimension_semantics=("parallel",),
            vmem_limit_bytes=vmem_limit),
        cost_estimate=pl.CostEstimate(flops=flops, transcendentals=0,
                                      bytes_accessed=bytes_accessed),
    )(*args)

    return jnp.transpose(out, (0, 3, 1, 2))                        # -> NCHW


# ----------------------------------------------------------------------------
# Parameter init (deterministic, synthetic): BN folded into scale/bias.
# ----------------------------------------------------------------------------
def _fold_bn(key, C, eps=1e-5):
    kg, kb, km, kv = jax.random.split(key, 4)
    gamma = 1.0 + 0.1 * jax.random.normal(kg, (C,), jnp.float32)
    beta = 0.1 * jax.random.normal(kb, (C,), jnp.float32)
    mean = 0.1 * jax.random.normal(km, (C,), jnp.float32)
    var = jnp.abs(jax.random.normal(kv, (C,), jnp.float32)) + 0.5
    scale = gamma / jnp.sqrt(var + eps)
    bias = beta - mean * scale
    return scale, bias


def init_params(key, cin, cmid, cout, cardinality, reduce):
    assert cmid % cardinality == 0
    cg = cmid // cardinality
    ks = jax.random.split(key, 8)

    w1 = 0.2 * jax.random.normal(ks[0], (cin, cmid), jnp.float32)     # conv1 (IO)
    s1, b1 = _fold_bn(ks[1], cmid)

    # Grouped 3x3 weights -> dense block-diagonal HWIO weight (3,3,cmid,cmid).
    # (Fine at toy cmid/cardinality; keep groups explicit for production shapes.)
    wg = 0.2 * jax.random.normal(ks[2], (cardinality, 3, 3, cg, cg), jnp.float32)
    w2 = jnp.zeros((3, 3, cmid, cmid), jnp.float32)
    for g in range(cardinality):
        w2 = w2.at[:, :, g * cg:(g + 1) * cg, g * cg:(g + 1) * cg].set(wg[g])
    s2, b2 = _fold_bn(ks[3], cmid)

    w3 = 0.2 * jax.random.normal(ks[4], (cmid, cout), jnp.float32)    # conv3 (IO)
    s3, b3 = _fold_bn(ks[5], cout)

    if reduce or cin != cout:
        ws = 0.2 * jax.random.normal(ks[6], (cin, cout), jnp.float32)
        ss, bs = _fold_bn(ks[7], cout)
    else:
        ws = ss = bs = None

    return dict(w1=w1, s1=s1, b1=b1, w2=w2, s2=s2, b2=b2,
                w3=w3, s3=s3, b3=b3, ws=ws, ss=ss, bs=bs)


# ----------------------------------------------------------------------------
# Pure-JAX reference (for correctness sanity check)
# ----------------------------------------------------------------------------
def reference_forward(x_nchw, p, *, reduce):
    x = jnp.transpose(x_nchw, (0, 2, 3, 1)).astype(jnp.float32)
    stride = 2 if reduce else 1
    dn = ('NHWC', 'HWIO', 'NHWC')

    def conv(a, w, s, pad):
        return jax.lax.conv_general_dilated(a, w, (s, s), pad,
                                            dimension_numbers=dn)

    out = conv(x, p['w1'][None, None], stride, 'VALID') * p['s1'] + p['b1']
    out = jnp.maximum(out, 0.0)
    out = conv(out, p['w2'], 1, 'SAME') * p['s2'] + p['b2']
    out = jnp.maximum(out, 0.0)
    out3 = conv(out, p['w3'][None, None], 1, 'VALID') * p['s3'] + p['b3']
    if p['ws'] is not None:
        sc = conv(x, p['ws'][None, None], stride, 'VALID') * p['ss'] + p['bs']
    else:
        sc = x
    out = jnp.maximum(out3 + sc, 0.0)
    return jnp.transpose(out, (0, 3, 1, 2))


# ----------------------------------------------------------------------------
if __name__ == "__main__":
    key = jax.random.PRNGKey(0)
    kx, kp = jax.random.split(key)

    # BottleneckBlock(in_channels=8, mid_channels=8, out_channels=16,
    #                 cardinality=4, reduce=True)
    N, CIN, H, W = 2, 8, 16, 16
    CMID, COUT, CARD, REDUCE = 8, 16, 4, True

    x = jax.random.normal(kx, (N, CIN, H, W), jnp.float32)   # NCHW like PyTorch
    params = init_params(kp, CIN, CMID, COUT, CARD, REDUCE)

    y = jax.block_until_ready(bottleneck_forward(x, params, reduce=REDUCE))
    assert y.shape == (N, COUT, H // 2, W // 2), y.shape

    # Reference uses bf16-rounded weights (as the kernel consumes); remaining
    # gap is in-kernel bf16 activation rounding with f32 accumulation.
    pref = dict(params)
    for k in ("w1", "w2", "w3", "ws"):
        if pref[k] is not None:
            pref[k] = pref[k].astype(jnp.bfloat16).astype(jnp.float32)
    y_ref = jax.block_until_ready(reference_forward(x, pref, reduce=REDUCE))

    err = float(jnp.max(jnp.abs(y - y_ref)))
    assert err < 1e-1, f"max abs error vs reference too large: {err}"

    print("KERNEL_OK")
</pallas_src>

<mosaic_0001>
module attributes {stable_mosaic.version = 11 : i64} {
  func.func @_bottleneck_kernel(%arg0: i32, %arg1: memref<2x8x8x8xbf16, #tpu.memory_space<vmem>>, %arg2: memref<8x24xbf16, #tpu.memory_space<vmem>>, %arg3: memref<1x24xf32, #tpu.memory_space<vmem>>, %arg4: memref<72x8xbf16, #tpu.memory_space<vmem>>, %arg5: memref<1x8xf32, #tpu.memory_space<vmem>>, %arg6: memref<8x16xbf16, #tpu.memory_space<vmem>>, %arg7: memref<1x16xf32, #tpu.memory_space<vmem>>, %arg8: memref<2x8x8x16xf32, #tpu.memory_space<vmem>>) attributes {dimension_semantics = [#tpu.dimension_semantics<parallel>], iteration_bounds = array<i64: 1>, scalar_prefetch = 0 : i64, scratch_operands = 0 : i64, tpu.core_type = #tpu.core_type<tc>, window_params = [{transform_indices = @transform_0, window_bounds = array<i64: 2, 8, 8, 8>}, {pipeline_mode = #tpu.pipeline_mode<synchronous>, transform_indices = @transform_1, window_bounds = array<i64: 8, 24>}, {pipeline_mode = #tpu.pipeline_mode<synchronous>, transform_indices = @transform_2, window_bounds = array<i64: 1, 24>}, {pipeline_mode = #tpu.pipeline_mode<synchronous>, transform_indices = @transform_3, window_bounds = array<i64: 72, 8>}, {pipeline_mode = #tpu.pipeline_mode<synchronous>, transform_indices = @transform_4, window_bounds = array<i64: 1, 8>}, {pipeline_mode = #tpu.pipeline_mode<synchronous>, transform_indices = @transform_5, window_bounds = array<i64: 8, 16>}, {pipeline_mode = #tpu.pipeline_mode<synchronous>, transform_indices = @transform_6, window_bounds = array<i64: 1, 16>}, {transform_indices = @transform_7, window_bounds = array<i64: 2, 8, 8, 16>}]} {
    %c0 = arith.constant 0 : index
    %c0_0 = arith.constant 0 : index
    %c0_1 = arith.constant 0 : index
    %c0_2 = arith.constant 0 : index
    %0 = vector.load %arg1[%c0, %c0_0, %c0_1, %c0_2] : memref<2x8x8x8xbf16, #tpu.memory_space<vmem>>, vector<2x8x8x8xbf16>
    %1 = vector.shape_cast %0 : vector<2x8x8x8xbf16> to vector<128x8xbf16>
    %c0_3 = arith.constant 0 : index
    %c0_4 = arith.constant 0 : index
    %2 = vector.load %arg2[%c0_3, %c0_4] : memref<8x24xbf16, #tpu.memory_space<vmem>>, vector<8x24xbf16>
    %cst = arith.constant dense<0.000000e+00> : vector<128x24xf32>
    %3 = tpu.matmul %1, %2, %cst {dimension_numbers = #tpu.dot_dimension_numbers<[1], [0], [0], [1], [0, 0, 1, 1], [], []>} : vector<128x8xbf16>, vector<8x24xbf16>, vector<128x24xf32> -> vector<128x24xf32>
    %c0_5 = arith.constant 0 : index
    %c0_6 = arith.constant 0 : index
    %4 = vector.load %arg3[%c0_5, %c0_6] : memref<1x24xf32, #tpu.memory_space<vmem>>, vector<1x24xf32>
    %5 = vector.broadcast %4 : vector<1x24xf32> to vector<128x24xf32>
    %6 = arith.addf %3, %5 : vector<128x24xf32>
    %7 = vector.extract_strided_slice %6 {offsets = [0, 0], sizes = [128, 8], strides = [1, 1]} : vector<128x24xf32> to vector<128x8xf32>
    %cst_7 = arith.constant 0.000000e+00 : f32
    %8 = vector.broadcast %cst_7 : f32 to vector<128x8xf32>
    %9 = arith.maximumf %7, %8 : vector<128x8xf32>
    %10 = vector.extract_strided_slice %6 {offsets = [0, 8], sizes = [128, 16], strides = [1, 1]} : vector<128x24xf32> to vector<128x16xf32>
    %11 = vector.shape_cast %9 : vector<128x8xf32> to vector<2x8x8x8xf32>
    %cst_8 = arith.constant 0.000000e+00 : f32
    %12 = vector.broadcast %cst_8 : f32 to vector<2x1x8x8xf32>
    %cst_9 = arith.constant 0.000000e+00 : f32
    %13 = vector.broadcast %cst_9 : f32 to vector<2x8x1x8xf32>
    %14 = vector.extract_strided_slice %11 {offsets = [0, 0, 0, 0], sizes = [2, 7, 8, 8], strides = [1, 1, 1, 1]} : vector<2x8x8x8xf32> to vector<2x7x8x8xf32>
    %15 = tpu.concatenate %12, %14 in 1 : vector<2x1x8x8xf32>, vector<2x7x8x8xf32> -> vector<2x8x8x8xf32>
    %16 = vector.extract_strided_slice %15 {offsets = [0, 0, 0, 0], sizes = [2, 8, 7, 8], strides = [1, 1, 1, 1]} : vector<2x8x8x8xf32> to vector<2x8x7x8xf32>
    %17 = tpu.concatenate %13, %16 in 2 : vector<2x8x1x8xf32>, vector<2x8x7x8xf32> -> vector<2x8x8x8xf32>
    %18 = vector.extract_strided_slice %11 {offsets = [0, 0, 0, 0], sizes = [2, 7, 8, 8], strides = [1, 1, 1, 1]} : vector<2x8x8x8xf32> to vector<2x7x8x8xf32>
    %19 = tpu.concatenate %12, %18 in 1 : vector<2x1x8x8xf32>, vector<2x7x8x8xf32> -> vector<2x8x8x8xf32>
    %20 = vector.extract_strided_slice %11 {offsets = [0, 0, 0, 0], sizes = [2, 7, 8, 8], strides = [1, 1, 1, 1]} : vector<2x8x8x8xf32> to vector<2x7x8x8xf32>
    %21 = tpu.concatenate %12, %20 in 1 : vector<2x1x8x8xf32>, vector<2x7x8x8xf32> -> vector<2x8x8x8xf32>
    %22 = vector.extract_strided_slice %21 {offsets = [0, 0, 1, 0], sizes = [2, 8, 7, 8], strides = [1, 1, 1, 1]} : vector<2x8x8x8xf32> to vector<2x8x7x8xf32>
    %23 = tpu.concatenate %22, %13 in 2 : vector<2x8x7x8xf32>, vector<2x8x1x8xf32> -> vector<2x8x8x8xf32>
    %24 = vector.extract_strided_slice %11 {offsets = [0, 0, 0, 0], sizes = [2, 8, 7, 8], strides = [1, 1, 1, 1]} : vector<2x8x8x8xf32> to vector<2x8x7x8xf32>
    %25 = tpu.concatenate %13, %24 in 2 : vector<2x8x1x8xf32>, vector<2x8x7x8xf32> -> vector<2x8x8x8xf32>
    %26 = vector.extract_strided_slice %11 {offsets = [0, 0, 1, 0], sizes = [2, 8, 7, 8], strides = [1, 1, 1, 1]} : vector<2x8x8x8xf32> to vector<2x8x7x8xf32>
    %27 = tpu.concatenate %26, %13 in 2 : vector<2x8x7x8xf32>, vector<2x8x1x8xf32> -> vector<2x8x8x8xf32>
    %28 = vector.extract_strided_slice %11 {offsets = [0, 1, 0, 0], sizes = [2, 7, 8, 8], strides = [1, 1, 1, 1]} : vector<2x8x8x8xf32> to vector<2x7x8x8xf32>
    %29 = tpu.concatenate %28, %12 in 1 : vector<2x7x8x8xf32>, vector<2x1x8x8xf32> -> vector<2x8x8x8xf32>
    %30 = vector.extract_strided_slice %29 {offsets = [0, 0, 0, 0], sizes = [2, 8, 7, 8], strides = [1, 1, 1, 1]} : vector<2x8x8x8xf32> to vector<2x8x7x8xf32>
    %31 = tpu.concatenate %13, %30 in 2 : vector<2x8x1x8xf32>, vector<2x8x7x8xf32> -> vector<2x8x8x8xf32>
    %32 = vector.extract_strided_slice %11 {offsets = [0, 1, 0, 0], sizes = [2, 7, 8, 8], strides = [1, 1, 1, 1]} : vector<2x8x8x8xf32> to vector<2x7x8x8xf32>
    %33 = tpu.concatenate %32, %12 in 1 : vector<2x7x8x8xf32>, vector<2x1x8x8xf32> -> vector<2x8x8x8xf32>
    %34 = vector.extract_strided_slice %11 {offsets = [0, 1, 0, 0], sizes = [2, 7, 8, 8], strides = [1, 1, 1, 1]} : vector<2x8x8x8xf32> to vector<2x7x8x8xf32>
    %35 = tpu.concatenate %34, %12 in 1 : vector<2x7x8x8xf32>, vector<2x1x8x8xf32> -> vector<2x8x8x8xf32>
    %36 = vector.extract_strided_slice %35 {offsets = [0, 0, 1, 0], sizes = [2, 8, 7, 8], strides = [1, 1, 1, 1]} : vector<2x8x8x8xf32> to vector<2x8x7x8xf32>
    %37 = tpu.concatenate %36, %13 in 2 : vector<2x8x7x8xf32>, vector<2x8x1x8xf32> -> vector<2x8x8x8xf32>
    %38 = tpu.concatenate %17, %19, %23, %25, %11, %27, %31, %33, %37 in 3 : vector<2x8x8x8xf32>, vector<2x8x8x8xf32>, vector<2x8x8x8xf32>, vector<2x8x8x8xf32>, vector<2x8x8x8xf32>, vector<2x8x8x8xf32>, vector<2x8x8x8xf32>, vector<2x8x8x8xf32>, vector<2x8x8x8xf32> -> vector<2x8x8x72xf32>
    %39 = vector.shape_cast %38 : vector<2x8x8x72xf32> to vector<128x72xf32>
    %40 = arith.truncf %39 : vector<128x72xf32> to vector<128x72xbf16>
    %c0_10 = arith.constant 0 : index
    %c0_11 = arith.constant 0 : index
    %41 = vector.load %arg4[%c0_10, %c0_11] : memref<72x8xbf16, #tpu.memory_space<vmem>>, vector<72x8xbf16>
    %cst_12 = arith.constant dense<0.000000e+00> : vector<128x8xf32>
    %42 = tpu.matmul %40, %41, %cst_12 {dimension_numbers = #tpu.dot_dimension_numbers<[1], [0], [0], [1], [0, 0, 1, 1], [], []>} : vector<128x72xbf16>, vector<72x8xbf16>, vector<128x8xf32> -> vector<128x8xf32>
    %c0_13 = arith.constant 0 : index
    %c0_14 = arith.constant 0 : index
    %43 = vector.load %arg5[%c0_13, %c0_14] : memref<1x8xf32, #tpu.memory_space<vmem>>, vector<1x8xf32>
    %44 = vector.broadcast %43 : vector<1x8xf32> to vector<128x8xf32>
    %45 = arith.addf %42, %44 : vector<128x8xf32>
    %cst_15 = arith.constant 0.000000e+00 : f32
    %46 = vector.broadcast %cst_15 : f32 to vector<128x8xf32>
    %47 = arith.maximumf %45, %46 : vector<128x8xf32>
    %48 = arith.truncf %47 : vector<128x8xf32> to vector<128x8xbf16>
    %c0_16 = arith.constant 0 : index
    %c0_17 = arith.constant 0 : index
    %49 = vector.load %arg6[%c0_16, %c0_17] : memref<8x16xbf16, #tpu.memory_space<vmem>>, vector<8x16xbf16>
    %cst_18 = arith.constant dense<0.000000e+00> : vector<128x16xf32>
    %50 = tpu.matmul %48, %49, %cst_18 {dimension_numbers = #tpu.dot_dimension_numbers<[1], [0], [0], [1], [0, 0, 1, 1], [], []>} : vector<128x8xbf16>, vector<8x16xbf16>, vector<128x16xf32> -> vector<128x16xf32>
    %c0_19 = arith.constant 0 : index
    %c0_20 = arith.constant 0 : index
    %51 = vector.load %arg7[%c0_19, %c0_20] : memref<1x16xf32, #tpu.memory_space<vmem>>, vector<1x16xf32>
    %52 = vector.broadcast %51 : vector<1x16xf32> to vector<128x16xf32>
    %53 = arith.addf %50, %52 : vector<128x16xf32>
    %54 = arith.addf %53, %10 : vector<128x16xf32>
    %cst_21 = arith.constant 0.000000e+00 : f32
    %55 = vector.broadcast %cst_21 : f32 to vector<128x16xf32>
    %56 = arith.maximumf %54, %55 : vector<128x16xf32>
    %57 = vector.shape_cast %56 : vector<128x16xf32> to vector<2x8x8x16xf32>
    %c0_22 = arith.constant 0 : index
    %c0_23 = arith.constant 0 : index
    %c0_24 = arith.constant 0 : index
    %c0_25 = arith.constant 0 : index
    %58 = vector.load %arg8[%c0_22, %c0_23, %c0_24, %c0_25] : memref<2x8x8x16xf32, #tpu.memory_space<vmem>>, vector<2x8x8x16xf32>
    tpu.vector_store %arg8[%c0_22, %c0_23, %c0_24, %c0_25], %57 {strides = array<i32>} : memref<2x8x8x16xf32, #tpu.memory_space<vmem>>, vector<2x8x8x16xf32>,
    return
  }
  func.func @transform_0(%arg0: i32) -> (i32, i32, i32, i32) {
    %c0_i32 = arith.constant 0 : i32
    %c0_i32_0 = arith.constant 0 : i32
    %c0_i32_1 = arith.constant 0 : i32
    %c0_i32_2 = arith.constant 0 : i32
    return %arg0, %c0_i32, %c0_i32_0, %c0_i32_1 : i32, i32, i32, i32
  }
  func.func @transform_1(%arg0: i32) -> (i32, i32) {
    %c0_i32 = arith.constant 0 : i32
    %c0_i32_0 = arith.constant 0 : i32
    %c0_i32_1 = arith.constant 0 : i32
    return %c0_i32, %c0_i32_0 : i32, i32
  }
  func.func @transform_2(%arg0: i32) -> (i32, i32) {
    %c0_i32 = arith.constant 0 : i32
    %c0_i32_0 = arith.constant 0 : i32
    %c0_i32_1 = arith.constant 0 : i32
    return %c0_i32, %c0_i32_0 : i32, i32
  }
  func.func @transform_3(%arg0: i32) -> (i32, i32) {
    %c0_i32 = arith.constant 0 : i32
    %c0_i32_0 = arith.constant 0 : i32
    %c0_i32_1 = arith.constant 0 : i32
    return %c0_i32, %c0_i32_0 : i32, i32
  }
  func.func @transform_4(%arg0: i32) -> (i32, i32) {
    %c0_i32 = arith.constant 0 : i32
    %c0_i32_0 = arith.constant 0 : i32
    %c0_i32_1 = arith.constant 0 : i32
    return %c0_i32, %c0_i32_0 : i32, i32
  }
  func.func @transform_5(%arg0: i32) -> (i32, i32) {
    %c0_i32 = arith.constant 0 : i32
    %c0_i32_0 = arith.constant 0 : i32
    %c0_i32_1 = arith.constant 0 : i32
    return %c0_i32, %c0_i32_0 : i32, i32
  }
  func.func @transform_6(%arg0: i32) -> (i32, i32) {
    %c0_i32 = arith.constant 0 : i32
    %c0_i32_0 = arith.constant 0 : i32
    %c0_i32_1 = arith.constant 0 : i32
    return %c0_i32, %c0_i32_0 : i32, i32
  }
  func.func @transform_7(%arg0: i32) -> (i32, i32, i32, i32) {
    %c0_i32 = arith.constant 0 : i32
    %c0_i32_0 = arith.constant 0 : i32
    %c0_i32_1 = arith.constant 0 : i32
    %c0_i32_2 = arith.constant 0 : i32
    return %arg0, %c0_i32, %c0_i32_0, %c0_i32_1 : i32, i32, i32, i32
  }
}

</mosaic_0001>

<bundles_post_ra>
// kernel: tpu_custom_call.1
= control target key start
LH: loop header
LB: loop body
LE: loop exit
PB: predicated region body
PF: predicated region fallthrough
CT: control target
= control target key end

     0   :  { %12 = vsyncpa [#allocation3], 0  ;;  %s2666_s0 = inlined_call_operand.hbm [shape: bf16[2,8,8,8], index: 0, kind: input, shape index: {}]   ;;  %s2667_s1 = inlined_call_operand.vmem [shape: bf16[8,24], index: 1, kind: input, shape index: {}]   ;;  %s2668_s2 = inlined_call_operand.vmem [shape: f32[1,24], index: 2, kind: input, shape index: {}]   ;;  %s2669_s3 = inlined_call_operand.vmem [shape: bf16[72,8], index: 3, kind: input, shape index: {}]   ;;  %s2670_s4 = inlined_call_operand.vmem [shape: f32[1,8], index: 4, kind: input, shape index: {}]   ;;  %s2671_s5 = inlined_call_operand.vmem [shape: bf16[8,16], index: 5, kind: input, shape index: {}]   ;;  %s2672_s6 = inlined_call_operand.vmem [shape: f32[1,16], index: 6, kind: input, shape index: {}]   ;;  %s2673_s7 = inlined_call_operand.hbm [shape: f32[2,8,8,16], index: 7, kind: output, shape index: {}]  }
   0x1   :  { %13 = vsyncpa [#allocation4], 0  ;;  %s1875_s24 = smov [#allocation2]   ;;  %s1827_s28 = scalar_lea.hbm %s2666_s0, 1024 }
   0x2   :  { %s19_s25 = sshll.u32 %s1875_s24, 4  ;;  %p1828_p0 = scmp.ne.s32.totalorder %s2666_s0, %s1827_s28  ;;  %s20_s25 = int_to_ptr.vmem [resolvable:$true] %s19_s25 }
   0x3   :  { %p1831_p1 = scmp.lt.u32.totalorder %s1827_s28, %s2666_s0 }
   0x5   :  { %p1833_p2 = pnand %p1831_p1, %p1828_p0 }
   0x7   :  { %1836 = shalt.err (!%p1833_p2)
}
   0x8   :  { %s1837_s10 = scalar_lea.vmem %s20_s25, 1024  ;;  %p1842_p4 = scmp.lt.s32.totalorder %s20_s25, %s20_s25 }
   0x9   :  { %p1838_p3 = scmp.ne.s32.totalorder %s20_s25, %s1837_s10  ;;  %p1843_p5 = scmp.lt.s32.totalorder %s1837_s10, %s1837_s10 }
   0xb   :  { %p1844_p6 = por %p1843_p5, %p1842_p4 }
   0xd   :  { %p1845_p7 = pnand %p1844_p6, %p1838_p3 }
   0xf   :  { %1848 = shalt.err (!%p1845_p7)
}
  0x10   :  { %s1876_s11 = smov 64   ;;  %s1877_s12 = smov 4  }
  0x11   :  { %25 = dma.hbm_to_vmem [thread:$0]  %s2666_s0, 1024, %s20_s25, [#allocation3], %s1876_s11, %s1876_s11, %s1877_s12  }
  0x12   :  { %1871 = dma.done.wait [#allocation3], 1024  }
  0x13   :  { %1872 = vsyncadd [#allocation3], 4294966272  ;;  %vm131_vm0 = vcmask 1043456   ;;  %vm106_vm1 = vcmask 64512   ;;  %v58_v0 = vld [vmem:[%s2667_s1] sm:$0xf] }
  0x14   :  { %1501 = vmatprep.subr.msk.bf16.mxu0 %vm131_vm0, %v58_v0  ;;  %1502 = vmatprep.subr.msk.bf16.mxu1 %vm131_vm0, %v58_v0  ;;  %v133_v1 = vsel %vm131_vm0, %v58_v0, 0  ;;  %v1814_v2 = vld [vmem:[#allocation2] sm:$0xff]   ;;  %v1815_v3 = vld [vmem:[#allocation2 + $0x8] sm:$0xff]   ;;  %v1816_v4 = vld [vmem:[#allocation2 + $0x10] sm:$0xff]   ;;  %v1878_v28 = vmov 0.0   ;;  %s1880_s17 = smov 32  }
  0x15   :  { %1438 = vmatpush3.bf16.msra.mxu0 %v133_v1  ;;  %1500 = vmatpush3.bf16.msra.mxu1 %v133_v1  ;;  %v1817_v5 = vld [vmem:[#allocation2 + $0x18] sm:$0xff]   ;;  %v1818_v6 = vld [vmem:[#allocation2 + $0x20] sm:$0xff]   ;;  %v1819_v7 = vld [vmem:[#allocation2 + $0x28] sm:$0xff]   ;;  %s1881_s18 = smov 56   ;;  %v309_v58 = vrot.slane %v1878_v28, 1  ;;  %vm339_vm2 = vcmask 1046528  }
  0x16   :  { %1439 = vmatprep.mubr.msk.bf16.mxu0 %vm106_vm1, %v1814_v2  ;;  %1443 = vmatprep.mubr.msk.bf16.mxu1 %vm106_vm1, %v1816_v4  ;;  %v1820_v8 = vld [vmem:[#allocation2 + $0x30] sm:$0xff]   ;;  %v1821_v9 = vld [vmem:[#allocation2 + $0x38] sm:$0xff]   ;;  %v1960_v10 = vld [vmem:[%s2668_s2] ss:$0 sm:$0xff]  ;;  %s1879_s2 = smov 8   ;;  %vm293_vm3 = vcmask 1040384  }
  0x17   :  { %v340_v63 = vsel %vm339_vm2, %v309_v58, 0.0  ;;  %s1882_s19 = smov 16   ;;  %s1883_s20 = smov 24   ;;  %vm787_vm4 = vcmask 130048   ;;  %vm803_vm5 = vcmask 195584   ;;  %vm820_vm6 = vcmask 261120  }
  0x18   :  { %1440 = vmatmul.mubr.msk.bf16.vlgmr.msra.gmra.mrb[0].mxu0 %vm106_vm1, %v1815_v3  ;;  %1444 = vmatmul.mubr.msk.bf16.vlgmr.msra.gmra.mrb[0].mxu1 %vm106_vm1, %v1817_v5  ;;  %s1884_s21 = smov 40   ;;  %s1885_s24 = smov 48   ;;  %vm837_vm7 = vcmask 326656   ;;  %vm854_vm8 = vcmask 392192   ;;  %vm871_vm9 = vcmask 457728   ;;  %vm888_vm10 = vcmask 523264  }
  0x19   :  { %1447 = vmatprep.mubr.msk.bf16.mxu1 %vm106_vm1, %v1818_v6  ;;  %vm956_vm11 = vcmask 588800  }
  0x20   :  { %1448 = vmatmul.mubr.msk.bf16.gmra.mrb[4].mxu1 %vm106_vm1, %v1819_v7 }
  0x21   :  { %1451 = vmatprep.mubr.msk.bf16.mxu1 %vm106_vm1, %v1820_v8 }
  0x28   :  { %1452 = vmatmul.mubr.msk.bf16.gmra.mrb[8].mxu1 %vm106_vm1, %v1821_v9 }
  0xeb   :  { %v1441_v11 = vpop.f32.mrb[0].mxu0  ;;  %v1445_v14 = vpop.f32.mrb[0].mxu1 }
  0xec   :  { %v1963_v12 = vadd.f32 %v1441_v11, %v1960_v10  ;;  %v169_v13 = vpop.f32.mrb[1].mxu0  ;;  %v185_v17 = vpop.f32.mrb[1].mxu1  ;;  %v2003_v35 = vadd.f32 %v1445_v14, %v1960_v10 }
  0xed   :  { %v1966_v15 = vadd.f32 %v1960_v10, %v169_v13  ;;  %v1442_v16 = vpop.f32.mrb[2].mxu0  ;;  %v1972_v19 = vadd.f32 %v1960_v10, %v185_v17  ;;  %v1446_v21 = vpop.f32.mrb[2].mxu1 }
  0xee   :  { %v1969_v18 = vadd.f32 %v1442_v16, %v1960_v10  ;;  %v172_v20 = vpop.f32.mrb[3].mxu0  ;;  %v188_v24 = vpop.f32.mrb[3].mxu1  ;;  %v1981_v25 = vmax.f32 %v1963_v12, 0.0  ;;  %v2006_v36 = vadd.f32 %v1446_v21, %v1960_v10  ;;  %v2020_v42 = vmax.f32 %v2003_v35, 0.0 }
  0xef   :  { %v1975_v22 = vmax.f32 %v1966_v15, 0.0  ;;  %v1978_v23 = vadd.f32 %v1960_v10, %v172_v20  ;;  %v1992_v30 = vmax.f32 %v1972_v19, 0.0  ;;  %v2015_v40 = vadd.f32 %v1960_v10, %v188_v24 }
  0xf0   :  { %v1984_v26 = vmax.f32 %v1969_v18, 0.0  ;;  %v2023_v43 = vmax.f32 %v2006_v36, 0.0  ;;  %v266_v4 = vrot.slane %v1981_v25, 7  ;;  %v312_v11 = vrot.slane %v1981_v25, 1 }
  0xf1   :  { %v1987_v27 = vmax.f32 %v1978_v23, 0.0  ;;  %v1519_v29 = vpack.i.bf16 %v1975_v22, %v1878_v28  ;;  %v2028_v45 = vmax.f32 %v2015_v40, 0.0  ;;  %v314_v57 = vrot.slane %v1992_v30, 1 }
  0xf2   :  { %v1524_v31 = vpack.i.bf16 %v1984_v26, %v1981_v25  ;;  %v1529_v37 = vpack.i.bf16 %v1992_v30, %v1984_v26  ;;  %v1539_v47 = vpack.i.bf16 %v2023_v43, %v2020_v42  ;;  %v1544_v55 = vpack.i.bf16 %v1878_v28, %v2023_v43 }
  0xf3   :  { %1520 = vrot.lane.b32.xlu0 %v1519_v29, %s1879_s2  ;;  %v1998_v32 = vpop.f32.mrb[4].mxu1  ;;  %v1549_v33 = vpack.i.bf16 %v1981_v25, %v1987_v27  ;;  %v1554_v41 = vpack.i.bf16 %v1987_v27, %v1975_v22  ;;  %v1569_v53 = vpack.i.bf16 %v2028_v45, %v1992_v30  ;;  %v313_v56 = vrot.slane %v1984_v26, 1 }
  0xf4   :  { %1525 = vrot.lane.b32.xlu1 %v1524_v31, %s1880_s17  ;;  %v201_v34 = vpop.f32.mrb[5].mxu1  ;;  %v310_v59 = vrot.slane %v1975_v22, 1  ;;  %v1574_v60 = vpack.i.bf16 %v2020_v42, %v2028_v45  ;;  %v2060_v62 = vsel %vm339_vm2, %v314_v57, 0.0  ;;  %v267_v1 = vrot.slane %v1984_v26, 7 }
  0xf5   :  { %v2010_v38 = vpop.f32.mrb[6].mxu1  ;;  %v2033_v48 = vadd.f32 %v1960_v10, %v201_v34  ;;  %v344_v61 = vsel %vm339_vm2, %v313_v56, 0.0  ;;  %v363_v6 = vrot.slane %v2023_v43, 1  ;;  %v2082_v9 = vsel %vm293_vm3, 0.0, %v266_v4  ;;  %v1822_v34 = vld [vmem:[%s2669_s3] sm:$0xff]  }
  0xf6   :  { %v204_v39 = vpop.f32.mrb[7].mxu1  ;;  %v341_v0 = vsel %vm339_vm2, %v310_v59, 0.0  ;;  %v1599_v3 = vpack.i.bf16 %v2060_v62, %v344_v61  ;;  %v2075_v7 = vsel %vm293_vm3, 0.0, %v267_v1  ;;  %v265_v16 = vrot.slane %v1987_v27, 7  ;;  %1455 = vmatprep.subr.bf16.mxu1 %v1822_v34 }
  0xf7   :  { %1550 = vrot.lane.b32.xlu0 %v1549_v33, %s1879_s2  ;;  %v2038_v51 = vadd.f32 %v1960_v10, %v204_v39  ;;  %v1579_v5 = vpack.i.bf16 %v341_v0, %v340_v63  ;;  %v1584_v13 = vpack.i.bf16 %v2075_v7, %v2082_v9  ;;  %v367_v14 = vsel %vm339_vm2, %v363_v6, 0.0  ;;  %1456 = vmatpush3.bf16.msra.mxu1 %v1822_v34 }
  0xf8   :  { %1530 = vrot.lane.b32.xlu1 %v1529_v37, %s1881_s18  ;;  %v268_v17 = vrot.slane %v1992_v30, 7  ;;  %v264_v20 = vrot.slane %v1975_v22, 7  ;;  %v1624_v21 = vpack.i.bf16 %v340_v63, %v367_v14  ;;  %v343_v24 = vsel %vm339_vm2, %v312_v11, 0.0  ;;  %v1825_v63 = vld [vmem:[%s2669_s3 + $0x18] sm:$0xff]  }
  0xf9   :  { %v1589_v25 = vpack.i.bf16 %v344_v61, %v343_v24  ;;  %v2095_v26 = vsel %vm293_vm3, 0.0, %v265_v16  ;;  %v311_v29 = vrot.slane %v1987_v27, 1  ;;  %v270_v30 = vrot.slane %v2020_v42, 7 }
  0xfa   :  { %v2100_v31 = vsel %vm293_vm3, 0.0, %v268_v17  ;;  %v2106_v22 = vsel %vm293_vm3, 0.0, %v264_v20  ;;  %v269_v57 = vrot.slane %v2028_v45, 7  ;;  %v315_v61 = vrot.slane %v2028_v45, 1 }
  0xfb   :  { %1555 = vrot.lane.b32.xlu0 %v1554_v41, %s1880_s17  ;;  %v1453_v44 = vpop.f32.mrb[8].mxu1  ;;  %v1634_v27 = vpack.i.bf16 %v2095_v26, %v2106_v22  ;;  %v342_v39 = vsel %vm339_vm2, %v311_v29, 0.0  ;;  %v316_v41 = vrot.slane %v2020_v42, 1  ;;  %v2158_v1 = vadd.f32 %v2010_v38, %v1960_v10 }
  0xfc   :  { %1535 = vrot.lane.b32.xlu1 %v1529_v37, %s1879_s2  ;;  %v217_v46 = vpop.f32.mrb[9].mxu1  ;;  %v2041_v52 = vadd.f32 %v1453_v44, %v1960_v10  ;;  %v1594_v37 = vpack.i.bf16 %v2100_v31, %v2075_v7  ;;  %v346_v4 = vsel %vm339_vm2, %v315_v61, 0.0  ;;  %v241_v16 = vmax.f32 %v2038_v51, 0.0 }
  0xfd   :  { %v1454_v49 = vpop.f32.mrb[10].mxu1  ;;  %v2046_v54 = vadd.f32 %v1960_v10, %v217_v46  ;;  %v1639_v46 = vpack.i.bf16 %v342_v39, %v341_v0  ;;  %v347_v42 = vsel %vm339_vm2, %v316_v41, 0.0  ;;  %v2153_v0 = vadd.f32 %v1998_v32, %v1960_v10 }
  0xfe   :  { %v220_v50 = vpop.f32.mrb[11].mxu1  ;;  %v2068_v2 = vadd.f32 %v1454_v49, %v1960_v10  ;;  %v1614_v56 = vpack.i.bf16 %v367_v14, %v347_v42  ;;  %v243_v38 = vmax.f32 %v2158_v1, 0.0  ;;  %v1654_v6 = vpack.i.bf16 %v347_v42, %v346_v4 }
  0xff   :  { %1560 = vrot.lane.b32.xlu0 %v1549_v33, %s1881_s18  ;;  %v2078_v8 = vadd.f32 %v1960_v10, %v220_v50  ;;  %v357_v33 = vrot.slane %v2023_v43, 7  ;;  %v2119_v43 = vsel %vm293_vm3, 0.0, %v270_v30  ;;  %v263_v50 = vrot.slane %v1878_v28, 7 }
 0x100   :  { %1540 = vrot.lane.b32.xlu1 %v1539_v47, %s1880_s17  ;;  %v1823_v47 = vld [vmem:[%s2669_s3 + $0x8] sm:$0xff]   ;;  %v1649_v28 = vpack.i.bf16 %v343_v24, %v342_v39  ;;  %v242_v10 = vmax.f32 %v2153_v0, 0.0  ;;  %v240_v14 = vmax.f32 %v2033_v48, 0.0  ;;  %v320_v17 = vrot.slane %v243_v38, 1 }
 0x101   :  { %v361_v44 = vsel %vm293_vm3, 0.0, %v357_v33  ;;  %1457 = vmatprep.subr.bf16.mxu1 %v1823_v47  ;;  %v2139_v58 = vsel %vm293_vm3, 0.0, %v263_v50  ;;  %v318_v24 = vrot.slane %v241_v16, 1  ;;  %v274_v33 = vrot.slane %v243_v38, 7 }
 0x102   :  { %v1609_v49 = vpack.i.bf16 %v361_v44, %v2119_v43  ;;  %1458 = vmatpush3.bf16.msra.mxu1 %v1823_v47  ;;  %v1619_v59 = vpack.i.bf16 %v2139_v58, %v361_v44  ;;  %v1679_v11 = vpack.i.bf16 %v243_v38, %v242_v10  ;;  %v1694_v20 = vpack.i.bf16 %v241_v16, %v240_v14 }
 0x103   :  { %1570 = vrot.lane.b32.xlu0 %v1569_v53, %s1880_s17  ;;  %v1824_v53 = vld [vmem:[%s2669_s3 + $0x10] sm:$0xff]   ;;  %v351_v29 = vsel %vm339_vm2, %v320_v17, 0.0  ;;  %v273_v30 = vrot.slane %v242_v10, 7  ;;  %v1699_v34 = vpack.i.bf16 %v242_v10, %v241_v16  ;;  %v349_v41 = vsel %vm339_vm2, %v318_v24, 0.0 }
 0x104   :  { %1545 = vrot.lane.b32.xlu1 %v1544_v55, %s1881_s18  ;;  %v1644_v55 = vpack.i.bf16 %v2082_v9, %v2095_v26  ;;  %1459 = vmatprep.subr.bf16.mxu1 %v1824_v53  ;;  %v272_v44 = vrot.slane %v241_v16, 7  ;;  %v2194_v47 = vsel %vm293_vm3, 0.0, %v274_v33 }
 0x106   :  { %1460 = vmatpush3.bf16.msra.mxu1 %v1824_v53  ;;  %v2203_v53 = vsel %vm293_vm3, 0.0, %v272_v44 }
 0x107   :  { %1575 = vrot.lane.b32.xlu0 %v1574_v60, %s1881_s18  ;;  %1461 = vmatprep.subr.bf16.mxu1 %v1825_v63 }
 0x108   :  { %1565 = vrot.lane.b32.xlu1 %v1574_v60, %s1879_s2  ;;  %v2144_v60 = vsel %vm293_vm3, 0.0, %v269_v57  ;;  %v244_v57 = vmax.f32 %v2046_v54, 0.0 }
 0x109   :  { %v1659_v45 = vpack.i.bf16 %v2144_v60, %v2100_v31 }
 0x10a   :  { %1462 = vmatpush3.bf16.msra.mxu1 %v1825_v63  ;;  %v1744_v61 = vpack.i.bf16 %v244_v57, %v243_v38  ;;  %v245_v63 = vmax.f32 %v2078_v8, 0.0 }
 0x10b   :  { %1600 = vrot.lane.b32.xlu0 %v1599_v3, %s1876_s11 }
 0x10c   :  { %1580 = vrot.lane.b32.xlu1 %v1579_v5, %s1882_s19  ;;  %v1664_v5 = vpack.i.bf16 %v346_v4, %v2060_v62  ;;  %v319_v62 = vrot.slane %v242_v10, 1  ;;  %v1759_v4 = vpack.i.bf16 %v245_v63, %v244_v57  ;;  %v276_v16 = vrot.slane %v245_v63, 7 }
 0x10f   :  { %1605 = vrot.lane.b32.xlu0 %v1599_v3, %s1882_s19  ;;  %v1826_v3 = vld [vmem:[%s2669_s3 + $0x20] ss:$0 sps:$4 sm:$0xff]   ;;  %s1886_s3 = smov 120  }
 0x110   :  { %1585 = vrot.lane.b32.xlu1 %v1584_v13, %s1883_s20  ;;  %1503 = vmatprep.subr.msk.bf16.mxu1 %vm131_vm0, %v1826_v3  ;;  %v982_v32 = vsel %vm131_vm0, %v1826_v3, 0  ;;  %v1669_v13 = vpack.i.bf16 %v2119_v43, %v2144_v60 }
 0x111   :  { %1464 = vmatpush3.bf16.msra.mxu1 %v982_v32  ;;  %v321_v32 = vrot.slane %v244_v57, 1 }
 0x113   :  { %1625 = vrot.lane.b32.xlu0 %v1624_v21, %s1876_s11  ;;  %v317_v21 = vrot.slane %v240_v14, 1  ;;  %v352_v38 = vsel %vm339_vm2, %v321_v32, 0.0 }
 0x114   :  { %1590 = vrot.lane.b32.xlu1 %v1589_v25, %s1884_s21  ;;  %v350_v25 = vsel %vm339_vm2, %v319_v62, 0.0 }
 0x115   :  { %v348_v39 = vsel %vm339_vm2, %v317_v21, 0.0 }
 0x117   :  { %1635 = vrot.lane.b32.xlu0 %v1634_v27, %s1883_s20  ;;  %v271_v27 = vrot.slane %v240_v14, 7 }
 0x118   :  { %1595 = vrot.lane.b32.xlu1 %v1594_v37, %s1885_s24  ;;  %v1704_v37 = vpack.i.bf16 %v351_v29, %v350_v25 }
 0x119   :  { %v2200_v50 = vsel %vm293_vm3, 0.0, %v271_v27 }
 0x11b   :  { %1640 = vrot.lane.b32.xlu0 %v1639_v46, %s1884_s21  ;;  %v2191_v46 = vsel %vm293_vm3, 0.0, %v273_v30 }
 0x11c   :  { %1610 = vrot.lane.b32.xlu1 %v1609_v49, %s1883_s20  ;;  %v1719_v49 = vpack.i.bf16 %v349_v41, %v348_v39  ;;  %v1709_v42 = vpack.i.bf16 %v2194_v47, %v2191_v46 }
 0x11f   :  { %1645 = vrot.lane.b32.xlu0 %v1644_v55, %s1885_s24  ;;  %v1724_v55 = vpack.i.bf16 %v2203_v53, %v2200_v50 }
 0x120   :  { %1615 = vrot.lane.b32.xlu1 %v1614_v56, %s1884_s21  ;;  %v246_v56 = vmax.f32 %v2041_v52, 0.0 }
 0x122   :  { %v1764_v10 = vpack.i.bf16 %v246_v56, %v245_v63 }
 0x123   :  { %1650 = vrot.lane.b32.xlu0 %v1649_v28, %s1876_s11 }
 0x124   :  { %1620 = vrot.lane.b32.xlu1 %v1619_v59, %s1885_s24  ;;  %v247_v59 = vmax.f32 %v2068_v2, 0.0 }
 0x126   :  { %v1749_v3 = vpack.i.bf16 %v247_v59, %v246_v56  ;;  %v358_v21 = vrot.slane %v247_v59, 7 }
 0x127   :  { %1660 = vrot.lane.b32.xlu0 %v1659_v45, %s1883_s20  ;;  %v1739_v45 = vpack.i.bf16 %v350_v25, %v349_v41 }
 0x128   :  { %1630 = vrot.lane.b32.xlu1 %v1649_v28, %s1882_s19  ;;  %v1734_v28 = vpack.i.bf16 %v2191_v46, %v2203_v53  ;;  %v362_v33 = vsel %vm293_vm3, 0.0, %v358_v21 }
 0x12b   :  { %1665 = vrot.lane.b32.xlu0 %v1664_v5, %s1884_s21  ;;  %v322_v5 = vrot.slane %v245_v63, 1 }
 0x12c   :  { %1655 = vrot.lane.b32.xlu1 %v1654_v6, %s1882_s19 }
 0x12d   :  { %v353_v14 = vsel %vm339_vm2, %v322_v5, 0.0 }
 0x12e   :  { %v1789_v24 = vpack.i.bf16 %v353_v14, %v352_v38 }
 0x12f   :  { %1670 = vrot.lane.b32.xlu0 %v1669_v13, %s1885_s24  ;;  %v1774_v13 = vpack.i.bf16 %v352_v38, %v351_v29  ;;  %v2238_v29 = vsel %vm293_vm3, 0.0, %v276_v16 }
 0x130   :  { %1680 = vrot.lane.b32.xlu1 %v1679_v11, %s1879_s2 }
 0x133   :  { %1675 = vrot.lane.b32.xlu0 %v1654_v6, %s1876_s11  ;;  %v323_v6 = vrot.slane %v246_v56, 1 }
 0x134   :  { %1685 = vrot.lane.b32.xlu1 %v1679_v11, %s1880_s17  ;;  %v275_v11 = vrot.slane %v244_v57, 7 }
 0x135   :  { %v354_v62 = vsel %vm339_vm2, %v323_v6, 0.0 }
 0x136   :  { %v2232_v17 = vsel %vm293_vm3, 0.0, %v275_v11 }
 0x137   :  { %1695 = vrot.lane.b32.xlu0 %v1694_v20, %s1880_s17  ;;  %v1769_v25 = vpack.i.bf16 %v2232_v17, %v2194_v47  ;;  %v1794_v27 = vpack.i.bf16 %v2238_v29, %v2232_v17 }
 0x138   :  { %1690 = vrot.lane.b32.xlu1 %v1694_v20, %s1879_s2  ;;  %v277_v20 = vrot.slane %v246_v56, 7 }
 0x13a   :  { %v2242_v30 = vsel %vm293_vm3, 0.0, %v277_v20 }
 0x13b   :  { %1700 = vrot.lane.b32.xlu0 %v1699_v34, %s1881_s18  ;;  %v364_v34 = vrot.slane %v247_v59, 1 }
 0x13c   :  { %1705 = vrot.lane.b32.xlu1 %v1704_v37, %s1882_s19 }
 0x13d   :  { %v368_v39 = vsel %vm339_vm2, %v364_v34, 0.0 }
 0x13f   :  { %1720 = vrot.lane.b32.xlu0 %v1719_v49, %s1882_s19 }
 0x140   :  { %1710 = vrot.lane.b32.xlu1 %v1709_v42, %s1883_s20 }
 0x143   :  { %1725 = vrot.lane.b32.xlu0 %v1724_v55, %s1883_s20  ;;  %v1804_v55 = vpack.i.bf16 %v2242_v30, %v2238_v29 }
 0x144   :  { %1715 = vrot.lane.b32.xlu1 %v1704_v37, %s1884_s21  ;;  %v1779_v37 = vpack.i.bf16 %v362_v33, %v2242_v30 }
 0x147   :  { %1730 = vrot.lane.b32.xlu0 %v1719_v49, %s1884_s21  ;;  %v1784_v49 = vpack.i.bf16 %v368_v39, %v354_v62 }
 0x148   :  { %397 = vrot.lane.b32.xlu1 %v246_v56, %s1879_s2 }
 0x14b   :  { %1735 = vrot.lane.b32.xlu0 %v1734_v28, %s1885_s24  ;;  %v1809_v28 = vpack.i.bf16 %v354_v62, %v353_v14 }
 0x14c   :  { %1745 = vrot.lane.b32.xlu1 %v1744_v61, %s1881_s18 }
 0x14f   :  { %1740 = vrot.lane.b32.xlu0 %v1739_v45, %s1876_s11 }
 0x150   :  { %1750 = vrot.lane.b32.xlu1 %v1749_v3, %s1880_s17 }
 0x153   :  { %1760 = vrot.lane.b32.xlu0 %v1759_v4, %s1880_s17 }
 0x154   :  { %710 = vrot.lane.b32.xlu1 %v247_v59, %s1881_s18 }
 0x157   :  { %1765 = vrot.lane.b32.xlu0 %v1764_v10, %s1881_s18 }
 0x158   :  { %1755 = vrot.lane.b32.xlu1 %v1759_v4, %s1879_s2 }
 0x15b   :  { %1775 = vrot.lane.b32.xlu0 %v1774_v13, %s1876_s11 }
 0x15c   :  { %457 = vrot.lane.b32.xlu1 %v354_v62, %s1882_s19 }
 0x15f   :  { %1790 = vrot.lane.b32.xlu0 %v1789_v24, %s1882_s19 }
 0x160   :  { %1770 = vrot.lane.b32.xlu1 %v1769_v25, %s1885_s24 }
 0x163   :  { %1795 = vrot.lane.b32.xlu0 %v1794_v27, %s1883_s20 }
 0x164   :  { %1780 = vrot.lane.b32.xlu1 %v1779_v37, %s1883_s20 }
 0x165   :  { %v2252_v41 = vpop.permute.xlu0 %1520 }
 0x166   :  { %v2254_v44 = vpop.permute.xlu1 %1525 }
 0x167   :  { %1800 = vrot.lane.b32.xlu0 %v1789_v24, %s1884_s21 }
 0x168   :  { %1785 = vrot.lane.b32.xlu1 %v1784_v49, %s1884_s21 }
 0x169   :  { %v2258_v42 = vpop.permute.xlu0 %1550 }
 0x16a   :  { %v2262_v56 = vpop.permute.xlu1 %1530  ;;  %v1553_v10 = vunpack.i.h.bf16 %v2258_v42  ;;  %v1552_v13 = vunpack.i.l.bf16 %v2258_v42 }
 0x16b   :  { %1805 = vrot.lane.b32.xlu0 %v1804_v55, %s1885_s24  ;;  %v1533_v62 = vunpack.i.h.bf16 %v2262_v56  ;;  %v1532_v25 = vunpack.i.l.bf16 %v2262_v56 }
 0x16c   :  { %665 = vrot.lane.b32.xlu1 %v362_v33, %s1885_s24  ;;  %v2339_v24 = vsel %vm106_vm1, %v2082_v9, %v1553_v10  ;;  %v2355_v9 = vsel %vm106_vm1, %v2095_v26, %v1552_v13 }
 0x16d   :  { %v2266_v57 = vpop.permute.xlu0 %1555 }
 0x16e   :  { %v2268_v59 = vpop.permute.xlu1 %1535 }
 0x16f   :  { %1810 = vrot.lane.b32.xlu0 %v1809_v28, %s1876_s11  ;;  %v1538_v14 = vunpack.i.h.bf16 %v2268_v59  ;;  %v1537_v20 = vunpack.i.l.bf16 %v2268_v59 }
 0x170   :  { %755 = vrot.lane.b32.xlu1 %v368_v39, %s1876_s11  ;;  %v1558_v39 = vunpack.i.h.bf16 %v2266_v57 }
 0x171   :  { %v2272_v61 = vpop.permute.xlu0 %1560  ;;  %v777_v49 = vsel %vm106_vm1, %v2100_v31, %v1538_v14  ;;  %v776_v42 = vsel %vm106_vm1, %v2075_v7, %v1537_v20 }
 0x172   :  { %v2274_v63 = vpop.permute.xlu1 %1540  ;;  %v1562_v55 = vunpack.i.l.bf16 %v2272_v61 }
 0x173   :  { %1253 = vrot.lane.b32.xlu0 %v1966_v15, %s1886_s3  ;;  %v1543_v26 = vunpack.i.h.bf16 %v2274_v63 }
 0x174   :  { %1255 = vrot.lane.b32.xlu1 %v1978_v23, %s1886_s3 }
 0x175   :  { %v2280_v45 = vpop.permute.xlu0 %1570 }
 0x176   :  { %v2282_v3 = vpop.permute.xlu1 %1545  ;;  %v1573_v10 = vunpack.i.h.bf16 %v2280_v45 }
 0x177   :  { %1257 = vrot.lane.b32.xlu0 %v1963_v12, %s1886_s3 }
 0x178   :  { %1259 = vrot.lane.b32.xlu1 %v1969_v18, %s1886_s3 }
 0x179   :  { %v2288_v4 = vpop.permute.xlu0 %1575 }
 0x17a   :  { %v2290_v32 = vpop.permute.xlu1 %1565  ;;  %v1578_v13 = vunpack.i.h.bf16 %v2288_v4 }
 0x17b   :  { %1261 = vrot.lane.b32.xlu0 %v1972_v19, %s1886_s3 }
 0x17c   :  { %1263 = vrot.lane.b32.xlu1 %v2015_v40, %s1886_s3 }
 0x17d   :  { %v2296_v15 = vpop.permute.xlu0 %1600 }
 0x17e   :  { %v1581_v23 = vpop.permute.xlu1 %1580 }
 0x17f   :  { %1265 = vrot.lane.b32.xlu0 %v2003_v35, %s1886_s3  ;;  %v1523_v35 = vunpack.i.h.bf16 %v2252_v41  ;;  %v1582_v38 = vunpack.i.l.bf16 %v1581_v23 }
 0x180   :  { %1267 = vrot.lane.b32.xlu1 %v2006_v36, %s1886_s3  ;;  %v1522_v36 = vunpack.i.l.bf16 %v2252_v41  ;;  %v1557_v41 = vunpack.i.l.bf16 %v2266_v57 }
 0x181   :  { %v2302_v12 = vpop.permute.xlu0 %1605 }
 0x182   :  { %v2304_v18 = vpop.permute.xlu1 %1585  ;;  %v772_v16 = vsel %vm106_vm1, %v2139_v58, %v1522_v36  ;;  %v1567_v36 = vunpack.i.l.bf16 %v2290_v32 }
 0x183   :  { %1269 = vrot.lane.b32.xlu0 %v2033_v48, %s1886_s3 }
 0x184   :  { %1271 = vrot.lane.b32.xlu1 %v2038_v51, %s1886_s3  ;;  %v1583_v51 = vunpack.i.h.bf16 %v1581_v23 }
 0x185   :  { %v2310_v19 = vpop.permute.xlu0 %1625 }
 0x186   :  { %v2312_v40 = vpop.permute.xlu1 %1590 }
 0x187   :  { %1273 = vrot.lane.b32.xlu0 %v2153_v0, %s1886_s3  ;;  %v1528_v0 = vunpack.i.h.bf16 %v2254_v44 }
 0x188   :  { %1275 = vrot.lane.b32.xlu1 %v2158_v1, %s1886_s3  ;;  %v1527_v1 = vunpack.i.l.bf16 %v2254_v44 }
 0x189   :  { %v1636_v48 = vpop.permute.xlu0 %1635 }
 0x18a   :  { %v2321_v5 = vpop.permute.xlu1 %1595  ;;  %v1638_v6 = vunpack.i.h.bf16 %v1636_v48  ;;  %v1637_v11 = vunpack.i.l.bf16 %v1636_v48 }
 0x18b   :  { %1277 = vrot.lane.b32.xlu0 %v2046_v54, %s1886_s3  ;;  %v773_v54 = vsel %vm106_vm1, %v2106_v22, %v1523_v35 }
 0x18c   :  { %1279 = vrot.lane.b32.xlu1 %v2078_v8, %s1886_s3  ;;  %v2343_v8 = vsel %vm787_vm4, %v772_v16, %v1582_v38  ;;  %v789_v58 = vsel %vm787_vm4, %v773_v54, %v1583_v51  ;;  %v1577_v16 = vunpack.i.l.bf16 %v2288_v4  ;;  %v1607_v54 = vunpack.i.l.bf16 %v2302_v12 }
 0x18d   :  { %v1641_v21 = vpop.permute.xlu0 %1640  ;;  %v804_v22 = vsel %vm803_vm5, %v2343_v8, %v1637_v11  ;;  %v805_v34 = vsel %vm803_vm5, %v789_v58, %v1638_v6  ;;  %v1572_v6 = vunpack.i.l.bf16 %v2280_v45  ;;  %v1548_v11 = vunpack.i.h.bf16 %v2282_v3 }
 0x18e   :  { %v2346_v33 = vpop.permute.xlu1 %1610  ;;  %v1643_v27 = vunpack.i.h.bf16 %v1641_v21  ;;  %v1642_v37 = vunpack.i.l.bf16 %v1641_v21  ;;  %v821_v59 = vsel %vm820_vm6, %v804_v22, %v1557_v41  ;;  %v822_v57 = vsel %vm820_vm6, %v805_v34, %v1558_v39 }
 0x18f   :  { %1281 = vrot.lane.b32.xlu0 %v2041_v52, %s1886_s3  ;;  %v1563_v52 = vunpack.i.h.bf16 %v2272_v61  ;;  %v1542_v61 = vunpack.i.l.bf16 %v2274_v63  ;;  %v778_v45 = vsel %vm106_vm1, %v2144_v60, %v1567_v36  ;;  %v1602_v39 = vunpack.i.l.bf16 %v2296_v15 }
 0x190   :  { %1283 = vrot.lane.b32.xlu1 %v2068_v2, %s1886_s3  ;;  %v1568_v2 = vunpack.i.h.bf16 %v2290_v32  ;;  %v838_v7 = vsel %vm837_vm7, %v821_v59, %v1642_v37  ;;  %v839_v48 = vsel %vm837_vm7, %v822_v57, %v1643_v27  ;;  %v1608_v32 = vunpack.i.h.bf16 %v2302_v12 }
 0x191   :  { %v1646_v28 = vpop.permute.xlu0 %1645  ;;  %v1603_v37 = vunpack.i.h.bf16 %v2296_v15  ;;  %v1588_v59 = vunpack.i.h.bf16 %v2304_v18  ;;  %v1592_v36 = vunpack.i.l.bf16 %v2312_v40 }
 0x192   :  { %v1648_v23 = vunpack.i.h.bf16 %v1646_v28  ;;  %v1647_v31 = vunpack.i.l.bf16 %v1646_v28  ;;  %v2370_v35 = vpop.permute.xlu1 %1615  ;;  %v779_v22 = vsel %vm106_vm1, %v2119_v43, %v1568_v2  ;;  %v793_v28 = vsel %vm787_vm4, %v777_v49, %v1608_v32 }
 0x193   :  { %v1587_v43 = vunpack.i.l.bf16 %v2304_v18  ;;  %v1597_v49 = vunpack.i.l.bf16 %v2321_v5  ;;  %v1613_v18 = vunpack.i.h.bf16 %v2346_v33  ;;  %v1612_v32 = vunpack.i.l.bf16 %v2346_v33 }
 0x194   :  { %v855_v51 = vsel %vm854_vm8, %v838_v7, %v1647_v31  ;;  %v856_v38 = vsel %vm854_vm8, %v839_v48, %v1648_v23  ;;  %v1598_v7 = vunpack.i.h.bf16 %v2321_v5  ;;  %v1618_v56 = vunpack.i.h.bf16 %v2370_v35 }
 0x195   :  { %v1651_v14 = vpop.permute.xlu0 %1650  ;;  %v872_v34 = vsel %vm871_vm9, %v855_v51, %v1562_v55  ;;  %v873_v27 = vsel %vm871_vm9, %v856_v38, %v1563_v52  ;;  %v792_v55 = vsel %vm787_vm4, %v776_v42, %v1607_v54  ;;  %v1593_v52 = vunpack.i.h.bf16 %v2312_v40 }
 0x196   :  { %v1653_v20 = vunpack.i.h.bf16 %v1651_v14  ;;  %v1652_v21 = vunpack.i.l.bf16 %v1651_v14  ;;  %v2386_v58 = vpop.permute.xlu1 %1620  ;;  %v1617_v14 = vunpack.i.l.bf16 %v2370_v35 }
 0x198   :  { %v889_v12 = vsel %vm888_vm10, %v872_v34, %v1652_v21  ;;  %v890_v41 = vsel %vm888_vm10, %v873_v27, %v1653_v20 }
 0x199   :  { %v905_v57 = vpack.c.bf16 %v890_v41, %v889_v12  ;;  %v1661_v60 = vpop.permute.xlu0 %1660 }
 0x19a   :  { %v1663_v23 = vunpack.i.h.bf16 %v1661_v60  ;;  %v1662_v31 = vunpack.i.l.bf16 %v1661_v60  ;;  %v1631_v2 = vpop.permute.xlu1 %1630 }
 0x19b   :  { %v1633_v48 = vunpack.i.h.bf16 %v1631_v2  ;;  %v1632_v51 = vunpack.i.l.bf16 %v1631_v2  ;;  %1465 = vmatprep.mubr.msk.bf16.mxu1 %vm956_vm11, %v905_v57 }
 0x19c   :  { %v809_v38 = vsel %vm803_vm5, %v793_v28, %v1663_v23  ;;  %v808_v42 = vsel %vm803_vm5, %v792_v55, %v1662_v31 }
 0x19d   :  { %v791_v40 = vsel %vm787_vm4, %v2339_v24, %v1633_v48  ;;  %v790_v54 = vsel %vm787_vm4, %v2355_v9, %v1632_v51  ;;  %v1666_v20 = vpop.permute.xlu0 %1665  ;;  %v825_v34 = vsel %vm820_vm6, %v808_v42, %v1572_v6  ;;  %v826_v27 = vsel %vm820_vm6, %v809_v38, %v1573_v10 }
 0x19e   :  { %v806_v21 = vsel %vm803_vm5, %v790_v54, %v1587_v43  ;;  %v807_v5 = vsel %vm803_vm5, %v791_v40, %v1588_v59  ;;  %v1656_v12 = vpop.permute.xlu1 %1655  ;;  %v1668_v59 = vunpack.i.h.bf16 %v1666_v20  ;;  %v1667_v57 = vunpack.i.l.bf16 %v1666_v20 }
 0x19f   :  { %v823_v33 = vsel %vm820_vm6, %v806_v21, %v1527_v1  ;;  %v824_v24 = vsel %vm820_vm6, %v807_v5, %v1528_v0  ;;  %v1658_v41 = vunpack.i.h.bf16 %v1656_v12  ;;  %v1657_v9 = vunpack.i.l.bf16 %v1656_v12 }
 0x1a0   :  { %v840_v28 = vsel %vm837_vm7, %v823_v33, %v1592_v36  ;;  %v841_v43 = vsel %vm837_vm7, %v824_v24, %v1593_v52  ;;  %v843_v36 = vsel %vm837_vm7, %v826_v27, %v1668_v59  ;;  %v1628_v27 = vunpack.i.h.bf16 %v2310_v19 }
 0x1a1   :  { %v857_v6 = vsel %vm854_vm8, %v840_v28, %v1597_v49  ;;  %v858_v10 = vsel %vm854_vm8, %v841_v43, %v1598_v7  ;;  %v795_v60 = vsel %vm787_vm4, %v779_v22, %v1658_v41  ;;  %v794_v1 = vsel %vm787_vm4, %v778_v45, %v1657_v9  ;;  %v1671_v55 = vpop.permute.xlu0 %1670 }
 0x1a2   :  { %v874_v44 = vsel %vm871_vm9, %v857_v6, %v1532_v25  ;;  %v875_v0 = vsel %vm871_vm9, %v858_v10, %v1533_v62  ;;  %v810_v52 = vsel %vm803_vm5, %v794_v1, %v1612_v32  ;;  %v811_v23 = vsel %vm803_vm5, %v795_v60, %v1613_v18  ;;  %v2440_v31 = vpop.permute.xlu1 %1680 }
 0x1a3   :  { %v827_v22 = vsel %vm820_vm6, %v810_v52, %v1542_v61  ;;  %v828_v45 = vsel %vm820_vm6, %v811_v23, %v1543_v26  ;;  %v1673_v2 = vunpack.i.h.bf16 %v1671_v55  ;;  %v1672_v25 = vunpack.i.l.bf16 %v1671_v55 }
 0x1a4   :  { %v842_v62 = vsel %vm837_vm7, %v825_v34, %v1667_v57  ;;  %v844_v7 = vsel %vm837_vm7, %v827_v22, %v1617_v14  ;;  %v891_v61 = vsel %vm888_vm10, %v874_v44, %v1602_v39  ;;  %v892_v63 = vsel %vm888_vm10, %v875_v0, %v1603_v37 }
 0x1a5   :  { %v859_v48 = vsel %vm854_vm8, %v842_v62, %v1672_v25  ;;  %v860_v51 = vsel %vm854_vm8, %v843_v36, %v1673_v2  ;;  %v1676_v49 = vpop.permute.xlu0 %1675  ;;  %v1622_v26 = vunpack.i.l.bf16 %v2386_v58  ;;  %v845_v35 = vsel %vm837_vm7, %v828_v45, %v1618_v56 }
 0x1a6   :  { %v1678_v18 = vunpack.i.h.bf16 %v1676_v49  ;;  %v1677_v38 = vunpack.i.l.bf16 %v1676_v49  ;;  %v2460_v42 = vpop.permute.xlu1 %1685  ;;  %v1547_v32 = vunpack.i.l.bf16 %v2282_v3  ;;  %v1623_v14 = vunpack.i.h.bf16 %v2386_v58  ;;  %v1105_v3 = vld [vmem:[%s2671_s5] sm:$0xf] }
 0x1a7   :  { %v876_v39 = vsel %vm871_vm9, %v859_v48, %v1577_v16  ;;  %v877_v15 = vsel %vm871_vm9, %v860_v51, %v1578_v13  ;;  %v906_v54 = vpack.c.bf16 %v892_v63, %v891_v61  ;;  %v861_v20 = vsel %vm854_vm8, %v844_v7, %v1622_v26  ;;  %1504 = vmatprep.subr.msk.bf16.mxu0 %vm131_vm0, %v1105_v3 }
 0x1a8   :  { %v893_v37 = vsel %vm888_vm10, %v876_v39, %v1677_v38  ;;  %v894_v40 = vsel %vm888_vm10, %v877_v15, %v1678_v18  ;;  %v862_v34 = vsel %vm854_vm8, %v845_v35, %v1623_v14  ;;  %v878_v4 = vsel %vm871_vm9, %v861_v20, %v1547_v32 }
 0x1a9   :  { %v907_v21 = vpack.c.bf16 %v894_v40, %v893_v37  ;;  %v1696_v5 = vpop.permute.xlu0 %1695  ;;  %1466 = vmatmul.mubr.msk.bf16.vlgmr.msra.gmra.mrb[12].mxu1 %vm956_vm11, %v906_v54  ;;  %v879_v13 = vsel %vm871_vm9, %v862_v34, %v1548_v11  ;;  %v1627_v12 = vunpack.i.l.bf16 %v2310_v19  ;;  %v1383_v19 = vld [vmem:[%s2670_s4] ss:$0 sm:$0xff] }
 0x1aa   :  { %v1691_v16 = vpop.permute.xlu1 %1690  ;;  %v896_v41 = vsel %vm888_vm10, %v879_v13, %v1628_v27  ;;  %v1698_v56 = vunpack.i.h.bf16 %v1696_v5  ;;  %v1697_v62 = vunpack.i.l.bf16 %v1696_v5 }
 0x1ab   :  { %1469 = vmatprep.mubr.msk.bf16.mxu1 %vm956_vm11, %v907_v21  ;;  %v895_v24 = vsel %vm888_vm10, %v878_v4, %v1627_v12  ;;  %v1692_v57 = vunpack.i.l.bf16 %v1691_v16  ;;  %v1693_v34 = vunpack.i.h.bf16 %v1691_v16  ;;  %v1682_v12 = vunpack.i.l.bf16 %v2440_v31 }
 0x1ac   :  { %v908_v28 = vpack.c.bf16 %v896_v41, %v895_v24 }
 0x1ad   :  { %v1701_v33 = vpop.permute.xlu0 %1700  ;;  %v780_v44 = vsel %vm106_vm1, %v2200_v50, %v1692_v57  ;;  %v781_v41 = vsel %vm106_vm1, %v2203_v53, %v1693_v34  ;;  %v782_v16 = vsel %vm106_vm1, %v2191_v46, %v1682_v12 }
 0x1ae   :  { %v2488_v9 = vpop.permute.xlu1 %1705  ;;  %v1703_v35 = vunpack.i.h.bf16 %v1701_v33  ;;  %v1702_v18 = vunpack.i.l.bf16 %v1701_v33 }
 0x1af   :  { %v1707_v33 = vunpack.i.l.bf16 %v2488_v9 }
 0x1b1   :  { %v1721_v43 = vpop.permute.xlu0 %1720  ;;  %1470 = vmatmul.mubr.msk.bf16.gmra.mrb[16].mxu1 %vm956_vm11, %v908_v28 }
 0x1b2   :  { %v1711_v59 = vpop.permute.xlu1 %1710  ;;  %v1722_v10 = vunpack.i.l.bf16 %v1721_v43  ;;  %v1723_v13 = vunpack.i.h.bf16 %v1721_v43  ;;  %v1683_v43 = vunpack.i.h.bf16 %v2440_v31 }
 0x1b3   :  { %v1713_v28 = vunpack.i.h.bf16 %v1711_v59  ;;  %v1712_v57 = vunpack.i.l.bf16 %v1711_v59 }
 0x1b4   :  { %v796_v52 = vsel %vm787_vm4, %v780_v44, %v1722_v10  ;;  %v797_v10 = vsel %vm787_vm4, %v781_v41, %v1723_v13  ;;  %v783_v46 = vsel %vm106_vm1, %v2194_v47, %v1683_v43 }
 0x1b5   :  { %v1726_v6 = vpop.permute.xlu0 %1725  ;;  %v814_v44 = vsel %vm803_vm5, %v797_v10, %v1712_v57 }
 0x1b6   :  { %v2491_v60 = vpop.permute.xlu1 %1715  ;;  %v1728_v1 = vunpack.i.h.bf16 %v1726_v6  ;;  %v1727_v55 = vunpack.i.l.bf16 %v1726_v6 }
 0x1b7   :  { %v1717_v53 = vunpack.i.l.bf16 %v2491_v60 }
 0x1b8   :  { %v812_v22 = vsel %vm803_vm5, %v2343_v8, %v1727_v55  ;;  %v813_v45 = vsel %vm803_vm5, %v796_v52, %v1728_v1  ;;  %v798_v1 = vsel %vm787_vm4, %v782_v16, %v1707_v33  ;;  %v1718_v52 = vunpack.i.h.bf16 %v2491_v60 }
 0x1b9   :  { %v1731_v0 = vpop.permute.xlu0 %1730  ;;  %v829_v7 = vsel %vm820_vm6, %v812_v22, %v1697_v62  ;;  %v830_v48 = vsel %vm820_vm6, %v813_v45, %v1698_v56  ;;  %v1688_v22 = vunpack.i.h.bf16 %v2460_v42  ;;  %v1687_v45 = vunpack.i.l.bf16 %v2460_v42 }
 0x1ba   :  { %v398_v23 = vpop.permute.xlu1 %397  ;;  %v1733_v2 = vunpack.i.h.bf16 %v1731_v0  ;;  %v1732_v25 = vunpack.i.l.bf16 %v1731_v0  ;;  %v815_v0 = vsel %vm803_vm5, %v798_v1, %v1713_v28  ;;  %v1708_v62 = vunpack.i.h.bf16 %v2488_v9 }
 0x1bb   :  { %v831_v31 = vsel %vm820_vm6, %v814_v44, %v1687_v45 }
 0x1bc   :  { %v846_v61 = vsel %vm837_vm7, %v829_v7, %v1732_v25  ;;  %v847_v63 = vsel %vm837_vm7, %v830_v48, %v1733_v2  ;;  %v832_v25 = vsel %vm820_vm6, %v815_v0, %v1688_v22  ;;  %v786_v7 = vsel %vm106_vm1, %v2242_v30, %v398_v23 }
 0x1bd   :  { %v1736_v36 = vpop.permute.xlu0 %1735  ;;  %v849_v60 = vsel %vm837_vm7, %v832_v25, %v1718_v52  ;;  %v799_v33 = vsel %vm787_vm4, %v783_v46, %v1708_v62 }
 0x1be   :  { %v1738_v51 = vunpack.i.h.bf16 %v1736_v36  ;;  %v1737_v50 = vunpack.i.l.bf16 %v1736_v36  ;;  %v2501_v49 = vpop.permute.xlu1 %1745  ;;  %v848_v36 = vsel %vm837_vm7, %v831_v31, %v1717_v53 }
 0x1bf   :  { %v1748_v42 = vunpack.i.h.bf16 %v2501_v49 }
 0x1c0   :  { %v863_v8 = vsel %vm854_vm8, %v846_v61, %v1737_v50  ;;  %v864_v26 = vsel %vm854_vm8, %v847_v63, %v1738_v51  ;;  %v1747_v51 = vunpack.i.l.bf16 %v2501_v49 }
 0x1c1   :  { %v1741_v38 = vpop.permute.xlu0 %1740  ;;  %v880_v37 = vsel %vm871_vm9, %v863_v8, %v1702_v18  ;;  %v881_v40 = vsel %vm871_vm9, %v864_v26, %v1703_v35 }
 0x1c2   :  { %v1743_v32 = vunpack.i.h.bf16 %v1741_v38  ;;  %v1742_v39 = vunpack.i.l.bf16 %v1741_v38  ;;  %v2507_v15 = vpop.permute.xlu1 %1750 }
 0x1c3   :  { %v1753_v10 = vunpack.i.h.bf16 %v2507_v15  ;;  %v1752_v16 = vunpack.i.l.bf16 %v2507_v15 }
 0x1c4   :  { %v897_v54 = vsel %vm888_vm10, %v880_v37, %v1742_v39  ;;  %v898_v20 = vsel %vm888_vm10, %v881_v40, %v1743_v32 }
 0x1c5   :  { %v909_v21 = vpack.c.bf16 %v898_v20, %v897_v54  ;;  %v2513_v5 = vpop.permute.xlu0 %1760 }
 0x1c6   :  { %v2515_v4 = vpop.permute.xlu1 %710  ;;  %v1763_v53 = vunpack.i.h.bf16 %v2513_v5 }
 0x1c7   :  { %1473 = vmatprep.mubr.msk.bf16.mxu1 %vm956_vm11, %v909_v21 }
 0x1c9   :  { %v2520_v24 = vpop.permute.xlu0 %1765 }
 0x1ca   :  { %v1756_v6 = vpop.permute.xlu1 %1755 }
 0x1cb   :  { %v1758_v2 = vunpack.i.h.bf16 %v1756_v6  ;;  %v1757_v63 = vunpack.i.l.bf16 %v1756_v6 }
 0x1cd   :  { %v1776_v55 = vpop.permute.xlu0 %1775  ;;  %v785_v61 = vsel %vm106_vm1, %v2238_v29, %v1758_v2  ;;  %v784_v21 = vsel %vm106_vm1, %v2232_v17, %v1757_v63 }
 0x1ce   :  { %v458_v59 = vpop.permute.xlu1 %457  ;;  %v1778_v8 = vunpack.i.h.bf16 %v1776_v55  ;;  %v1777_v26 = vunpack.i.l.bf16 %v1776_v55 }
 0x1cf   :  { %v802_v34 = vsel %vm787_vm4, %v786_v7, %v458_v59  ;;  %v1762_v59 = vunpack.i.l.bf16 %v2513_v5 }
 0x1d1   :  { %v1791_v56 = vpop.permute.xlu0 %1790 }
 0x1d2   :  { %v1771_v48 = vpop.permute.xlu1 %1770  ;;  %v1793_v9 = vunpack.i.h.bf16 %v1791_v56  ;;  %v1792_v35 = vunpack.i.l.bf16 %v1791_v56 }
 0x1d3   :  { %v1773_v47 = vunpack.i.h.bf16 %v1771_v48  ;;  %v1772_v50 = vunpack.i.l.bf16 %v1771_v48 }
 0x1d4   :  { %v801_v13 = vsel %vm787_vm4, %v785_v61, %v1793_v9  ;;  %v800_v41 = vsel %vm787_vm4, %v784_v21, %v1792_v35 }
 0x1d5   :  { %v865_v18 = vsel %vm854_vm8, %v848_v36, %v1772_v50  ;;  %v866_v38 = vsel %vm854_vm8, %v849_v60, %v1773_v47  ;;  %v1796_v30 = vpop.permute.xlu0 %1795  ;;  %v1768_v47 = vunpack.i.h.bf16 %v2520_v24  ;;  %v1767_v50 = vunpack.i.l.bf16 %v2520_v24 }
 0x1d6   :  { %v882_v23 = vsel %vm871_vm9, %v865_v18, %v1747_v51  ;;  %v883_v32 = vsel %vm871_vm9, %v866_v38, %v1748_v42  ;;  %v1798_v49 = vunpack.i.h.bf16 %v1796_v30  ;;  %v1797_v39 = vunpack.i.l.bf16 %v1796_v30  ;;  %v1781_v37 = vpop.permute.xlu1 %1780 }
 0x1d7   :  { %v1783_v40 = vunpack.i.h.bf16 %v1781_v37  ;;  %v1782_v54 = vunpack.i.l.bf16 %v1781_v37  ;;  %v899_v29 = vsel %vm888_vm10, %v882_v23, %v1777_v26  ;;  %v900_v20 = vsel %vm888_vm10, %v883_v32, %v1778_v8 }
 0x1d8   :  { %v910_v12 = vpack.c.bf16 %v900_v20, %v899_v29  ;;  %v816_v17 = vsel %vm803_vm5, %v799_v33, %v1797_v39  ;;  %v817_v43 = vsel %vm803_vm5, %v800_v41, %v1798_v49 }
 0x1d9   :  { %v819_v28 = vsel %vm803_vm5, %v802_v34, %v1783_v40  ;;  %v818_v57 = vsel %vm803_vm5, %v801_v13, %v1782_v54  ;;  %v1801_v6 = vpop.permute.xlu0 %1800  ;;  %v833_v31 = vsel %vm820_vm6, %v816_v17, %v1762_v59  ;;  %v834_v25 = vsel %vm820_vm6, %v817_v43, %v1763_v53 }
 0x1da   :  { %v1786_v1 = vpop.permute.xlu1 %1785  ;;  %1474 = vmatmul.mubr.msk.bf16.gmra.mrb[20].mxu1 %vm956_vm11, %v910_v12  ;;  %v1803_v55 = vunpack.i.h.bf16 %v1801_v6  ;;  %v1802_v44 = vunpack.i.l.bf16 %v1801_v6  ;;  %v836_v22 = vsel %vm820_vm6, %v819_v28, %v1753_v10  ;;  %v835_v45 = vsel %vm820_vm6, %v818_v57, %v1752_v16 }
 0x1db   :  { %v1788_v0 = vunpack.i.h.bf16 %v1786_v1  ;;  %v1787_v52 = vunpack.i.l.bf16 %v1786_v1 }
 0x1dc   :  { %v850_v60 = vsel %vm837_vm7, %v833_v31, %v1802_v44  ;;  %v851_v5 = vsel %vm837_vm7, %v834_v25, %v1803_v55 }
 0x1dd   :  { %v853_v15 = vsel %vm837_vm7, %v836_v22, %v1788_v0  ;;  %v1806_v2 = vpop.permute.xlu0 %1805  ;;  %v852_v46 = vsel %vm837_vm7, %v835_v45, %v1787_v52 }
 0x1de   :  { %v1808_v56 = vunpack.i.h.bf16 %v1806_v2  ;;  %v1807_v62 = vunpack.i.l.bf16 %v1806_v2  ;;  %v666_v36 = vpop.permute.xlu1 %665  ;;  %v870_v48 = vsel %vm854_vm8, %v853_v15, %v1623_v14 }
 0x1df   :  { %v869_v7 = vsel %vm854_vm8, %v852_v46, %v666_v36  ;;  %v887_v58 = vsel %vm871_vm9, %v870_v48, %v1548_v11  ;;  %v1138_v11 = vsel %vm131_vm0, %v1105_v3, 0 }
 0x1e0   :  { %v867_v42 = vsel %vm854_vm8, %v850_v60, %v1807_v62  ;;  %v868_v51 = vsel %vm854_vm8, %v851_v5, %v1808_v56  ;;  %v886_v26 = vsel %vm871_vm9, %v869_v7, %v2515_v4  ;;  %v904_v23 = vsel %vm888_vm10, %v887_v58, %v1628_v27  ;;  %1482 = vmatpush3.bf16.msra.mxu0 %v1138_v11 }
 0x1e1   :  { %v1811_v61 = vpop.permute.xlu0 %1810  ;;  %v884_v14 = vsel %vm871_vm9, %v867_v42, %v1767_v50  ;;  %v885_v35 = vsel %vm871_vm9, %v868_v51, %v1768_v47 }
 0x1e2   :  { %v1813_v63 = vunpack.i.h.bf16 %v1811_v61  ;;  %v1812_v8 = vunpack.i.l.bf16 %v1811_v61  ;;  %v756_v9 = vpop.permute.xlu1 %755 }
 0x1e3   :  { %v903_v18 = vsel %vm888_vm10, %v886_v26, %v756_v9 }
 0x1e4   :  { %v901_v38 = vsel %vm888_vm10, %v884_v14, %v1812_v8  ;;  %v902_v24 = vsel %vm888_vm10, %v885_v35, %v1813_v63  ;;  %v912_v4 = vpack.c.bf16 %v904_v23, %v903_v18  ;;  %v2619_v23 = vld [vmem:[%s2672_s6] ss:$0 sm:$0xff]  ;;  %s1887_s6 = smov [#allocation5]  }
 0x1e5   :  { %v911_v30 = vpack.c.bf16 %v902_v24, %v901_v38  ;;  %v1254_v38 = vpop.permute.xlu0 %1253  ;;  %s1354_s14 = sshll.u32 %s1887_s6, 4  ;;  %s1355_s14 = int_to_ptr.vmem [resolvable:$true] %s1354_s14 }
 0x1e6   :  { %v1256_v24 = vpop.permute.xlu1 %1255  ;;  %s1849_s15 = scalar_lea.vmem %s1355_s14, 2048  ;;  %p1854_p9 = scmp.lt.s32.totalorder %s1355_s14, %s1355_s14 }
 0x1e7   :  { %1477 = vmatprep.mubr.msk.bf16.mxu1 %vm956_vm11, %v911_v30  ;;  %p1850_p8 = scmp.ne.s32.totalorder %s1355_s14, %s1849_s15  ;;  %p1855_p10 = scmp.lt.s32.totalorder %s1849_s15, %s1849_s15 }
 0x1e8   :  { %1478 = vmatmul.mubr.msk.bf16.gmra.mrb[24].mxu1 %vm956_vm11, %v912_v4 }
 0x1e9   :  { %v1258_v30 = vpop.permute.xlu0 %1257  ;;  %p1856_p11 = por %p1855_p10, %p1854_p9 }
 0x1ea   :  { %v1260_v4 = vpop.permute.xlu1 %1259 }
 0x1eb   :  { %p1857_p12 = pnand %p1856_p11, %p1850_p8 }
 0x27c   :  { %v1467_v32 = vpop.f32.mrb[12].mxu1 }
 0x27d   :  { %v1027_v27 = vadd.f32 %v1467_v32, %v1383_v19  ;;  %v1018_v49 = vpop.f32.mrb[13].mxu1 }
 0x27e   :  { %v1019_v39 = vadd.f32 %v1383_v19, %v1018_v49  ;;  %v1468_v37 = vpop.f32.mrb[14].mxu1 }
 0x27f   :  { %v1030_v40 = vadd.f32 %v1468_v37, %v1383_v19  ;;  %v1021_v54 = vpop.f32.mrb[15].mxu1  ;;  %v1083_v20 = vmax.f32 %v1027_v27, 0.0 }
 0x280   :  { %v1022_v29 = vadd.f32 %v1383_v19, %v1021_v54  ;;  %v1081_v34 = vmax.f32 %v1019_v39, 0.0 }
 0x281   :  { %v1084_v21 = vmax.f32 %v1030_v40, 0.0  ;;  %v1262_v40 = vpop.permute.xlu0 %1261 }
 0x282   :  { %v1082_v13 = vmax.f32 %v1022_v29, 0.0 }
 0x283   :  { %v1098_v12 = vpack.c.bf16 %v1084_v21, %v1083_v20 }
 0x284   :  { %v1097_v33 = vpack.c.bf16 %v1082_v13, %v1081_v34  ;;  %v1471_v41 = vpop.f32.mrb[16].mxu1  ;;  %v1264_v34 = vpop.permute.xlu1 %1263 }
 0x285   :  { %v1043_v28 = vadd.f32 %v1471_v41, %v1383_v19  ;;  %v1034_v57 = vpop.f32.mrb[17].mxu1 }
 0x286   :  { %v1035_v6 = vadd.f32 %v1383_v19, %v1034_v57  ;;  %v1472_v10 = vpop.f32.mrb[18].mxu1  ;;  %1483 = vmatprep.mubr.msk.bf16.mxu0 %vm106_vm1, %v1097_v33 }
 0x287   :  { %v1046_v16 = vadd.f32 %v1472_v10, %v1383_v19  ;;  %v1037_v17 = vpop.f32.mrb[19].mxu1  ;;  %1484 = vmatmul.mubr.msk.bf16.vlgmr.msra.gmra.mrb[4].mxu0 %vm106_vm1, %v1098_v12  ;;  %v1087_v1 = vmax.f32 %v1043_v28, 0.0  ;;  %v1266_v10 = vpop.permute.xlu0 %1265 }
 0x288   :  { %v1038_v43 = vadd.f32 %v1383_v19, %v1037_v17  ;;  %v1085_v44 = vmax.f32 %v1035_v6, 0.0 }
 0x289   :  { %v1088_v55 = vmax.f32 %v1046_v16, 0.0 }
 0x28a   :  { %v1086_v0 = vmax.f32 %v1038_v43, 0.0 }
 0x28b   :  { %v1100_v52 = vpack.c.bf16 %v1088_v55, %v1087_v1 }
 0x28c   :  { %v1099_v53 = vpack.c.bf16 %v1086_v0, %v1085_v44  ;;  %v1268_v44 = vpop.permute.xlu1 %1267 }
 0x28e   :  { %1487 = vmatprep.mubr.msk.bf16.mxu0 %vm106_vm1, %v1099_v53 }
 0x28f   :  { %1488 = vmatmul.mubr.msk.bf16.gmra.mrb[8].mxu0 %vm106_vm1, %v1100_v52 }
 0x2ad   :  { %v1475_v59 = vpop.f32.mrb[20].mxu1 }
 0x2ae   :  { %v1059_v22 = vadd.f32 %v1475_v59, %v1383_v19  ;;  %v1050_v45 = vpop.f32.mrb[21].mxu1 }
 0x2af   :  { %v1051_v15 = vadd.f32 %v1383_v19, %v1050_v45  ;;  %v1476_v2 = vpop.f32.mrb[22].mxu1 }
 0x2b0   :  { %v1062_v46 = vadd.f32 %v1476_v2, %v1383_v19  ;;  %v1053_v31 = vpop.f32.mrb[23].mxu1  ;;  %v1091_v56 = vmax.f32 %v1059_v22, 0.0 }
 0x2b1   :  { %v1054_v25 = vadd.f32 %v1383_v19, %v1053_v31  ;;  %v1089_v36 = vmax.f32 %v1051_v15, 0.0  ;;  %v1272_v31 = vpop.permute.xlu1 %1271 }
 0x2b2   :  { %v1092_v62 = vmax.f32 %v1062_v46, 0.0  ;;  %v1270_v46 = vpop.permute.xlu0 %1269 }
 0x2b3   :  { %v1090_v60 = vmax.f32 %v1054_v25, 0.0 }
 0x2b4   :  { %v1102_v5 = vpack.c.bf16 %v1092_v62, %v1091_v56 }
 0x2b5   :  { %v1101_v7 = vpack.c.bf16 %v1090_v60, %v1089_v36 }
 0x2b6   :  { %v1274_v36 = vpop.permute.xlu0 %1273 }
 0x2b7   :  { %1491 = vmatprep.mubr.msk.bf16.mxu0 %vm106_vm1, %v1101_v7 }
 0x2b8   :  { %1492 = vmatmul.mubr.msk.bf16.gmra.mrb[12].mxu0 %vm106_vm1, %v1102_v5 }
 0x2bb   :  { %v1479_v48 = vpop.f32.mrb[24].mxu1 }
 0x2bc   :  { %v1075_v42 = vadd.f32 %v1479_v48, %v1383_v19  ;;  %v1066_v51 = vpop.f32.mrb[25].mxu1 }
 0x2bd   :  { %v1067_v47 = vadd.f32 %v1383_v19, %v1066_v51  ;;  %v1480_v50 = vpop.f32.mrb[26].mxu1  ;;  %v1276_v51 = vpop.permute.xlu1 %1275 }
 0x2be   :  { %v1078_v61 = vadd.f32 %v1480_v50, %v1383_v19  ;;  %v1069_v63 = vpop.f32.mrb[27].mxu1  ;;  %v1095_v9 = vmax.f32 %v1075_v42, 0.0 }
 0x2bf   :  { %v1070_v8 = vadd.f32 %v1383_v19, %v1069_v63  ;;  %v1093_v58 = vmax.f32 %v1067_v47, 0.0 }
 0x2c0   :  { %v1096_v26 = vmax.f32 %v1078_v61, 0.0 }
 0x2c1   :  { %v1094_v14 = vmax.f32 %v1070_v8, 0.0 }
 0x2c2   :  { %v1104_v35 = vpack.c.bf16 %v1096_v26, %v1095_v9 }
 0x2c3   :  { %v1103_v18 = vpack.c.bf16 %v1094_v14, %v1093_v58  ;;  %v1278_v14 = vpop.permute.xlu0 %1277 }
 0x2c5   :  { %1495 = vmatprep.mubr.msk.bf16.mxu0 %vm106_vm1, %v1103_v18 }
 0x2c6   :  { %1496 = vmatmul.mubr.msk.bf16.gmra.mrb[16].mxu0 %vm106_vm1, %v1104_v35  ;;  %v1280_v35 = vpop.permute.xlu1 %1279 }
 0x35a   :  { %v1485_v3 = vpop.f32.mrb[4].mxu0 }
 0x35b   :  { %v1183_v11 = vadd.f32 %v1485_v3, %v2619_v23  ;;  %v1174_v19 = vpop.f32.mrb[5].mxu0 }
 0x35c   :  { %v1175_v32 = vadd.f32 %v2619_v23, %v1174_v19  ;;  %v1486_v27 = vpop.f32.mrb[6].mxu0 }
 0x35d   :  { %v1303_v49 = vadd.f32 %v1258_v30, %v1183_v11  ;;  %v1186_v39 = vadd.f32 %v1486_v27, %v2619_v23  ;;  %v1177_v37 = vpop.f32.mrb[7].mxu0  ;;  %v1282_v30 = vpop.permute.xlu0 %1281 }
 0x35e   :  { %v1301_v54 = vadd.f32 %v1254_v38, %v1175_v32  ;;  %v1178_v29 = vadd.f32 %v2619_v23, %v1177_v37  ;;  %v1284_v27 = vpop.permute.xlu1 %1283 }
 0x35f   :  { %v1319_v20 = vmax.f32 %v1303_v49, 0.0  ;;  %v1304_v21 = vadd.f32 %v1260_v4, %v1186_v39 }
 0x360   :  { %v1317_v13 = vmax.f32 %v1301_v54, 0.0  ;;  %v1302_v12 = vadd.f32 %v1256_v24, %v1178_v29 }
 0x361   :  { %1335 = vst.msk [vmem:[#allocation5 + $0x10] sm:$0xff] %vm787_vm4, %v1319_v20  ;;  %v1320_v33 = vmax.f32 %v1304_v21, 0.0 }
 0x362   :  { %1333 = vst.msk [vmem:[#allocation5] sm:$0xff] %vm787_vm4, %v1317_v13  ;;  %v1318_v41 = vmax.f32 %v1302_v12, 0.0  ;;  %v1489_v28 = vpop.f32.mrb[8].mxu0 }
 0x363   :  { %1336 = vst.msk [vmem:[#allocation5 + $0x18] sm:$0xff] %vm787_vm4, %v1320_v33  ;;  %v1199_v57 = vadd.f32 %v1489_v28, %v2619_v23  ;;  %v1190_v6 = vpop.f32.mrb[9].mxu0 }
 0x364   :  { %1334 = vst.msk [vmem:[#allocation5 + $0x8] sm:$0xff] %vm787_vm4, %v1318_v41  ;;  %v1191_v16 = vadd.f32 %v2619_v23, %v1190_v6  ;;  %v1490_v17 = vpop.f32.mrb[10].mxu0 }
 0x365   :  { %v1307_v43 = vadd.f32 %v1266_v10, %v1199_v57  ;;  %v1202_v1 = vadd.f32 %v1490_v17, %v2619_v23  ;;  %v1193_v55 = vpop.f32.mrb[11].mxu0 }
 0x366   :  { %v1305_v0 = vadd.f32 %v1262_v40, %v1191_v16  ;;  %v1194_v52 = vadd.f32 %v2619_v23, %v1193_v55 }
 0x367   :  { %v1323_v53 = vmax.f32 %v1307_v43, 0.0  ;;  %v1308_v59 = vadd.f32 %v1268_v44, %v1202_v1 }
 0x368   :  { %v1321_v22 = vmax.f32 %v1305_v0, 0.0  ;;  %v1306_v45 = vadd.f32 %v1264_v34, %v1194_v52 }
 0x369   :  { %1339 = vst.msk [vmem:[#allocation5 + $0x30] sm:$0xff] %vm787_vm4, %v1323_v53  ;;  %v1324_v15 = vmax.f32 %v1308_v59, 0.0 }
 0x36a   :  { %1337 = vst.msk [vmem:[#allocation5 + $0x20] sm:$0xff] %vm787_vm4, %v1321_v22  ;;  %v1322_v2 = vmax.f32 %v1306_v45, 0.0 }
 0x36b   :  { %1340 = vst.msk [vmem:[#allocation5 + $0x38] sm:$0xff] %vm787_vm4, %v1324_v15 }
 0x36c   :  { %1338 = vst.msk [vmem:[#allocation5 + $0x28] sm:$0xff] %vm787_vm4, %v1322_v2 }
 0x38b   :  { %v1493_v25 = vpop.f32.mrb[12].mxu0 }
 0x38c   :  { %v1215_v56 = vadd.f32 %v1493_v25, %v2619_v23  ;;  %v1206_v62 = vpop.f32.mrb[13].mxu0 }
 0x38d   :  { %v1207_v60 = vadd.f32 %v2619_v23, %v1206_v62  ;;  %v1494_v5 = vpop.f32.mrb[14].mxu0 }
 0x38e   :  { %v1311_v7 = vadd.f32 %v1274_v36, %v1215_v56  ;;  %v1218_v48 = vadd.f32 %v1494_v5, %v2619_v23  ;;  %v1209_v42 = vpop.f32.mrb[15].mxu0 }
 0x38f   :  { %v1309_v47 = vadd.f32 %v1270_v46, %v1207_v60  ;;  %v1210_v50 = vadd.f32 %v2619_v23, %v1209_v42 }
 0x390   :  { %v1327_v61 = vmax.f32 %v1311_v7, 0.0  ;;  %v1312_v63 = vadd.f32 %v1276_v51, %v1218_v48 }
 0x391   :  { %v1325_v8 = vmax.f32 %v1309_v47, 0.0  ;;  %v1310_v9 = vadd.f32 %v1272_v31, %v1210_v50 }
 0x392   :  { %1343 = vst.msk [vmem:[#allocation5 + $0x50] sm:$0xff] %vm787_vm4, %v1327_v61  ;;  %v1328_v26 = vmax.f32 %v1312_v63, 0.0 }
 0x393   :  { %1341 = vst.msk [vmem:[#allocation5 + $0x40] sm:$0xff] %vm787_vm4, %v1325_v8  ;;  %v1326_v58 = vmax.f32 %v1310_v9, 0.0 }
 0x394   :  { %1344 = vst.msk [vmem:[#allocation5 + $0x58] sm:$0xff] %vm787_vm4, %v1328_v26 }
 0x395   :  { %1342 = vst.msk [vmem:[#allocation5 + $0x48] sm:$0xff] %vm787_vm4, %v1326_v58 }
 0x399   :  { %v1497_v18 = vpop.f32.mrb[16].mxu0 }
 0x39a   :  { %v1231_v38 = vadd.f32 %v1497_v18, %v2619_v23  ;;  %v1222_v24 = vpop.f32.mrb[17].mxu0 }
 0x39b   :  { %v1223_v4 = vadd.f32 %v2619_v23, %v1222_v24  ;;  %v1498_v3 = vpop.f32.mrb[18].mxu0 }
 0x39c   :  { %v1315_v11 = vadd.f32 %v1282_v30, %v1231_v38  ;;  %v1234_v19 = vadd.f32 %v1498_v3, %v2619_v23  ;;  %v1225_v32 = vpop.f32.mrb[19].mxu0 }
 0x39d   :  { %v1313_v49 = vadd.f32 %v1278_v14, %v1223_v4  ;;  %v1226_v39 = vadd.f32 %v2619_v23, %v1225_v32 }
 0x39e   :  { %v1331_v37 = vmax.f32 %v1315_v11, 0.0  ;;  %v1316_v40 = vadd.f32 %v1284_v27, %v1234_v19 }
 0x39f   :  { %v1329_v54 = vmax.f32 %v1313_v49, 0.0  ;;  %v1314_v29 = vadd.f32 %v1280_v35, %v1226_v39 }
 0x3a0   :  { %1347 = vst.msk [vmem:[#allocation5 + $0x70] sm:$0xff] %vm787_vm4, %v1331_v37  ;;  %v1332_v20 = vmax.f32 %v1316_v40, 0.0 }
 0x3a1   :  { %1345 = vst.msk [vmem:[#allocation5 + $0x60] sm:$0xff] %vm787_vm4, %v1329_v54  ;;  %v1330_v21 = vmax.f32 %v1314_v29, 0.0 }
 0x3a2   :  { %1348 = vst.msk [vmem:[#allocation5 + $0x78] sm:$0xff] %vm787_vm4, %v1332_v20 }
 0x3a3   :  { %1346 = vst.msk [vmem:[#allocation5 + $0x68] sm:$0xff] %vm787_vm4, %v1330_v21 }
 0x3a4   :  { %1860 = shalt.err (!%p1857_p12)
}
 0x3a5   :  { %s1861_s1 = scalar_lea.hbm %s2673_s7, 2048 }
 0x3a6   :  { %p1862_p13 = scmp.ne.s32.totalorder %s2673_s7, %s1861_s1  ;;  %p1865_p0 = scmp.lt.u32.totalorder %s1861_s1, %s2673_s7 }
 0x3a8   :  { %p1867_p1 = pnand %p1865_p0, %p1862_p13 }
 0x3aa   :  { %1870 = shalt.err (!%p1867_p1)
}
 0x3ab   :  { %s1888_s21 = smov 128  }
 0x3ac   :  { %1360 = dma.vmem_to_hbm [thread:$0]  %s1355_s14, 2048, %s2673_s7, [#allocation4], %s1888_s21, %s1888_s21, %s1879_s2  }
 0x3ad   :  { %1873 = dma.done.wait [#allocation4], 2048  }
 0x3ae   :  { %1874 = vsyncadd [#allocation4], 4294965248 }
 0x3af   :  { %1364 = vsyncpa [#allocation3], 1 }
 0x3b0   :  { %1365 = vsyncpa [#allocation4], 1 }

</bundles_post_ra>
